<compile_context>
chip_gen: v6e
topology: v6e:2x2x1
jax: 0.10.0
libtpu: 0.0.40
codegen_flags: <defaults>
</compile_context>

<pallas_src>
import functools

import jax
import jax.numpy as jnp
from jax.experimental import pallas as pl
from jax.experimental.pallas import tpu as pltpu


def _const_index_map(ndim):
    return lambda i: (0,) * ndim


def _xvector_kernel(n_conv, kernel_sizes, *refs):
    """One grid step == one contiguous batch block of NB samples."""
    idx = 0
    x_ref = refs[idx]; idx += 1                                  # (1, NB, T, C_in)
    conv_refs = []
    for _ in range(n_conv):
        conv_refs.append((refs[idx], refs[idx + 1])); idx += 2   # (W_im2col, [scale;shift])
    wa_ref, pa_ref = refs[idx], refs[idx + 1]; idx += 2          # (2C,E0), (3,E0)=[b;s;t]
    wb_ref, pb_ref = refs[idx], refs[idx + 1]; idx += 2          # (E0,E1), (3,E1)
    wc_ref, bc_ref = refs[idx], refs[idx + 1]; idx += 2          # (E1,cls), (1,cls)
    ea_ref, eb_ref, lp_ref = refs[idx], refs[idx + 1], refs[idx + 2]

    nb = x_ref.shape[1]

    means = []
    variances = []
    for n in range(nb):                                          # static unrolled batch block
        x = x_ref[0, n].astype(jnp.float32)                      # (T, C_in), channels-last

        # ---- TDNN stack: Conv1d -> BN(eval, folded) -> ReLU [-> Dropout(identity)]
        for li, (w_ref, ss_ref) in enumerate(conv_refs):
            k_sz = kernel_sizes[li]
            t_out = x.shape[0] - k_sz + 1
            # im2col: one matmul per layer, contraction depth K*C_in.
            slab = jnp.concatenate([x[k:k + t_out, :] for k in range(k_sz)], axis=-1)
            y = jnp.dot(slab.astype(jnp.bfloat16), w_ref[...],
                        preferred_element_type=jnp.float32)      # (t_out, C_out)
            y = y * ss_ref[0:1, :] + ss_ref[1:2, :]              # conv bias folded into BN shift
            x = jnp.maximum(y, 0.0)                              # ReLU
            # TODO(synk): nn.Dropout(0.5) between conv blocks treated as identity (inference)

        # ---- statistics pooling over time: mean + unbiased variance (torch.var default)
        t_fin = x.shape[0]
        mu = jnp.mean(x, axis=0, keepdims=True)                  # (1, C)
        d = x - mu
        denom = max(t_fin - 1, 1)                                # guard t_fin==1 (torch gives nan)
        va = jnp.sum(d * d, axis=0, keepdims=True) / denom
        means.append(mu)
        variances.append(va)

    mean_b = jnp.concatenate(means, axis=0)                      # (NB, C)
    var_b = jnp.concatenate(variances, axis=0)                   # (NB, C)
    c = mean_b.shape[1]

    # ---- embedding_a = Linear(concat([mean, var]))  (split-weight form avoids lane concat)
    wa = wa_ref[...]                                             # (2C, E0) bf16
    ha = (jnp.dot(mean_b.astype(jnp.bfloat16), wa[:c], preferred_element_type=jnp.float32)
          + jnp.dot(var_b.astype(jnp.bfloat16), wa[c:], preferred_element_type=jnp.float32)
          + pa_ref[0:1, :])                                      # (NB, E0)
    ea_ref[0] = ha.astype(ea_ref.dtype)                          # embed_a_out (pre-BN/ReLU)

    a = jnp.maximum(ha * pa_ref[1:2, :] + pa_ref[2:3, :], 0.0)   # embedding_layer_a: BN + ReLU
    # TODO(synk): inline nn.Dropout(0.5) in forward treated as identity (inference)

    hb = (jnp.dot(a.astype(jnp.bfloat16), wb_ref[...], preferred_element_type=jnp.float32)
          + pb_ref[0:1, :])                                      # (NB, E1)
    eb_ref[0] = hb.astype(eb_ref.dtype)                          # embed_b_out (pre-BN/ReLU)

    b = jnp.maximum(hb * pb_ref[1:2, :] + pb_ref[2:3, :], 0.0)   # embedding_layer_b: BN + ReLU

    logits = (jnp.dot(b.astype(jnp.bfloat16), wc_ref[...], preferred_element_type=jnp.float32)
              + bc_ref[...])                                     # (NB, num_classes)
    m = jnp.max(logits, axis=-1, keepdims=True)                  # log_softmax over classes
    z = logits - m
    lse = jnp.log(jnp.sum(jnp.exp(z), axis=-1, keepdims=True))
    lp_ref[0] = (z - lse).astype(lp_ref.dtype)


def init_params(key, input_dim, filter_sizes, kernel_sizes, embeded_sizes, num_classes):
    """Deterministic parameter init mirroring the PyTorch __init__ (eval-mode BN folded)."""
    eps = 1e-5
    bn_scale = float(1.0 / jnp.sqrt(1.0 + eps))  # gamma=1, running_var=1, running_mean=0, beta=0
    keys = jax.random.split(key, len(filter_sizes) + 3)

    conv = []
    prev = input_dim
    for i, (k_sz, f_sz) in enumerate(zip(kernel_sizes, filter_sizes)):
        w = 0.1 * jax.random.normal(keys[i], (f_sz, prev, k_sz), jnp.float32)   # torch (C_out,C_in,K)
        w_im2col = jnp.transpose(w, (2, 1, 0)).reshape(k_sz * prev, f_sz)       # (K*C_in, C_out)
        bias = jnp.full((f_sz,), 0.1, jnp.float32)
        scale = jnp.full((f_sz,), bn_scale, jnp.float32)
        shift = bias * scale                                                    # fold conv bias into BN shift
        conv.append((w_im2col.astype(jnp.bfloat16),
                     jnp.stack([scale, shift], axis=0)))                        # (2, C_out) f32
        prev = f_sz

    e0, e1 = embeded_sizes
    ka, kb, kc = keys[len(filter_sizes):]

    wa = 0.1 * jax.random.normal(ka, (e0, 2 * prev), jnp.float32)               # torch (out, in)
    wb = 0.1 * jax.random.normal(kb, (e1, e0), jnp.float32)
    bound = float(jnp.sqrt(6.0 / (e1 + num_classes)))                           # xavier_uniform_
    wc = jax.random.uniform(kc, (num_classes, e1), jnp.float32, -bound, bound)

    pa = jnp.stack([jnp.full((e0,), 0.1, jnp.float32),                          # linear bias
                    jnp.full((e0,), bn_scale, jnp.float32),                     # bn scale
                    jnp.zeros((e0,), jnp.float32)], axis=0)                     # bn shift
    pb = jnp.stack([jnp.full((e1,), 0.1, jnp.float32),
                    jnp.full((e1,), bn_scale, jnp.float32),
                    jnp.zeros((e1,), jnp.float32)], axis=0)

    return {
        "conv": conv,
        "wa": wa.T.astype(jnp.bfloat16), "pa": pa,
        "wb": wb.T.astype(jnp.bfloat16), "pb": pb,
        "wc": wc.T.astype(jnp.bfloat16), "bc": jnp.full((1, num_classes), 0.1, jnp.float32),
    }


def xvector_forward(x_nct, params, kernel_sizes, num_blocks=None):
    """x_nct: (N, C_in, T) float32, same layout as the PyTorch module's input."""
    n, c_in, t = x_nct.shape
    if num_blocks is None:
        num_blocks = 2 if (n % 2 == 0 and n >= 2) else 1   # 2-way split feeds both v7x TensorCores
    g = num_blocks
    assert n % g == 0, "batch must divide evenly into batch blocks"
    nb = n // g

    x = jnp.transpose(x_nct, (0, 2, 1)).reshape(g, nb, t, c_in)  # channels-last batch blocks

    e0 = params["wa"].shape[1]
    e1 = params["wb"].shape[1]
    ncls = params["wc"].shape[1]

    inputs = [x]
    for (w, ss) in params["conv"]:
        inputs += [w, ss]
    inputs += [params["wa"], params["pa"], params["wb"], params["pb"],
               params["wc"], params["bc"]]

    in_specs = [pl.BlockSpec((1, nb, t, c_in), lambda i: (i, 0, 0, 0))]
    for arr in inputs[1:]:
        in_specs.append(pl.BlockSpec(arr.shape, _const_index_map(arr.ndim)))

    out_shape = (jax.ShapeDtypeStruct((g, nb, e0), jnp.float32),
                 jax.ShapeDtypeStruct((g, nb, e1), jnp.float32),
                 jax.ShapeDtypeStruct((g, nb, ncls), jnp.float32))
    out_specs = (pl.BlockSpec((1, nb, e0), lambda i: (i, 0, 0)),
                 pl.BlockSpec((1, nb, e1), lambda i: (i, 0, 0)),
                 pl.BlockSpec((1, nb, ncls), lambda i: (i, 0, 0)))

    kernel = functools.partial(_xvector_kernel, len(params["conv"]), tuple(kernel_sizes))

    ea, eb, lp = pl.pallas_call(
        kernel,
        out_shape=out_shape,
        grid=(g,),
        in_specs=in_specs,
        out_specs=out_specs,
        compiler_params=pltpu.CompilerParams(dimension_semantics=("parallel",)),
    )(*inputs)

    return ea.reshape(n, e0), eb.reshape(n, e1), lp.reshape(n, ncls)


if __name__ == "__main__":
    key = jax.random.PRNGKey(0)
    kx, kp = jax.random.split(key)

    # XVector(input_vector_length=32, filter_sizes, kernel_sizes, num_classes,
    #         input_dim, embeded_sizes)  -- input_vector_length is unused in forward.
    N, input_dim, T = 4, 16, 32
    filter_sizes = [32, 32, 64]
    kernel_sizes = [3, 5, 3]
    embeded_sizes = [64, 32]
    num_classes = 16

    x = jax.random.normal(kx, (N, input_dim, T), jnp.float32)   # NCW, like PyTorch
    params = init_params(kp, input_dim, filter_sizes, kernel_sizes,
                         embeded_sizes, num_classes)

    embed_a, embed_b, logp = xvector_forward(x, params, kernel_sizes)
    jax.block_until_ready((embed_a, embed_b, logp))

    assert embed_a.shape == (N, embeded_sizes[0])
    assert embed_b.shape == (N, embeded_sizes[1])
    assert logp.shape == (N, num_classes)
    assert bool(jnp.all(jnp.isfinite(logp)))
    # log_softmax rows should sum to ~1 in prob space
    assert bool(jnp.all(jnp.abs(jnp.sum(jnp.exp(logp), axis=1) - 1.0) < 1e-4))

    print("KERNEL_OK")
</pallas_src>

<mosaic_0001>
module attributes {stable_mosaic.version = 11 : i64} {
  func.func @_xvector_kernel(%arg0: i32, %arg1: memref<1x2x32x16xf32, #tpu.memory_space<vmem>>, %arg2: memref<48x32xbf16, #tpu.memory_space<vmem>>, %arg3: memref<2x32xf32, #tpu.memory_space<vmem>>, %arg4: memref<160x32xbf16, #tpu.memory_space<vmem>>, %arg5: memref<2x32xf32, #tpu.memory_space<vmem>>, %arg6: memref<96x64xbf16, #tpu.memory_space<vmem>>, %arg7: memref<2x64xf32, #tpu.memory_space<vmem>>, %arg8: memref<128x64xbf16, #tpu.memory_space<vmem>>, %arg9: memref<3x64xf32, #tpu.memory_space<vmem>>, %arg10: memref<64x32xbf16, #tpu.memory_space<vmem>>, %arg11: memref<3x32xf32, #tpu.memory_space<vmem>>, %arg12: memref<32x16xbf16, #tpu.memory_space<vmem>>, %arg13: memref<1x16xf32, #tpu.memory_space<vmem>>, %arg14: memref<1x2x64xf32, #tpu.memory_space<vmem>>, %arg15: memref<1x2x32xf32, #tpu.memory_space<vmem>>, %arg16: memref<1x2x16xf32, #tpu.memory_space<vmem>>) attributes {dimension_semantics = [#tpu.dimension_semantics<parallel>], iteration_bounds = array<i64: 2>, scalar_prefetch = 0 : i64, scratch_operands = 0 : i64, tpu.core_type = #tpu.core_type<tc>, window_params = [{transform_indices = @transform_0, window_bounds = array<i64: 1, 2, 32, 16>}, {pipeline_mode = #tpu.pipeline_mode<synchronous>, transform_indices = @transform_1, window_bounds = array<i64: 48, 32>}, {pipeline_mode = #tpu.pipeline_mode<synchronous>, transform_indices = @transform_2, window_bounds = array<i64: 2, 32>}, {pipeline_mode = #tpu.pipeline_mode<synchronous>, transform_indices = @transform_3, window_bounds = array<i64: 160, 32>}, {pipeline_mode = #tpu.pipeline_mode<synchronous>, transform_indices = @transform_4, window_bounds = array<i64: 2, 32>}, {pipeline_mode = #tpu.pipeline_mode<synchronous>, transform_indices = @transform_5, window_bounds = array<i64: 96, 64>}, {pipeline_mode = #tpu.pipeline_mode<synchronous>, transform_indices = @transform_6, window_bounds = array<i64: 2, 64>}, {pipeline_mode = #tpu.pipeline_mode<synchronous>, transform_indices = @transform_7, window_bounds = array<i64: 128, 64>}, {pipeline_mode = #tpu.pipeline_mode<synchronous>, transform_indices = @transform_8, window_bounds = array<i64: 3, 64>}, {pipeline_mode = #tpu.pipeline_mode<synchronous>, transform_indices = @transform_9, window_bounds = array<i64: 64, 32>}, {pipeline_mode = #tpu.pipeline_mode<synchronous>, transform_indices = @transform_10, window_bounds = array<i64: 3, 32>}, {pipeline_mode = #tpu.pipeline_mode<synchronous>, transform_indices = @transform_11, window_bounds = array<i64: 32, 16>}, {pipeline_mode = #tpu.pipeline_mode<synchronous>, transform_indices = @transform_12, window_bounds = array<i64: 1, 16>}, {transform_indices = @transform_13, window_bounds = array<i64: 1, 2, 64>}, {transform_indices = @transform_14, window_bounds = array<i64: 1, 2, 32>}, {transform_indices = @transform_15, window_bounds = array<i64: 1, 2, 16>}]} {
    %c0 = arith.constant 0 : index
    %c0_0 = arith.constant 0 : index
    %c0_1 = arith.constant 0 : index
    %c0_2 = arith.constant 0 : index
    %0 = vector.load %arg1[%c0, %c0_0, %c0_1, %c0_2] : memref<1x2x32x16xf32, #tpu.memory_space<vmem>>, vector<1x1x32x16xf32>
    %1 = vector.shape_cast %0 : vector<1x1x32x16xf32> to vector<32x16xf32>
    %2 = vector.extract_strided_slice %1 {offsets = [0, 0], sizes = [30, 16], strides = [1, 1]} : vector<32x16xf32> to vector<30x16xf32>
    %3 = vector.extract_strided_slice %1 {offsets = [1, 0], sizes = [30, 16], strides = [1, 1]} : vector<32x16xf32> to vector<30x16xf32>
    %4 = vector.extract_strided_slice %1 {offsets = [2, 0], sizes = [30, 16], strides = [1, 1]} : vector<32x16xf32> to vector<30x16xf32>
    %5 = tpu.concatenate %2, %3, %4 in 1 : vector<30x16xf32>, vector<30x16xf32>, vector<30x16xf32> -> vector<30x48xf32>
    %6 = arith.truncf %5 : vector<30x48xf32> to vector<30x48xbf16>
    %c0_3 = arith.constant 0 : index
    %c0_4 = arith.constant 0 : index
    %7 = vector.load %arg2[%c0_3, %c0_4] : memref<48x32xbf16, #tpu.memory_space<vmem>>, vector<48x32xbf16>
    %cst = arith.constant dense<0.000000e+00> : vector<30x32xf32>
    %8 = tpu.matmul %6, %7, %cst {dimension_numbers = #tpu.dot_dimension_numbers<[1], [0], [0], [1], [0, 0, 1, 1], [], []>} : vector<30x48xbf16>, vector<48x32xbf16>, vector<30x32xf32> -> vector<30x32xf32>
    %c0_5 = arith.constant 0 : index
    %c0_6 = arith.constant 0 : index
    %9 = vector.load %arg3[%c0_5, %c0_6] : memref<2x32xf32, #tpu.memory_space<vmem>>, vector<1x32xf32>
    %10 = vector.broadcast %9 : vector<1x32xf32> to vector<30x32xf32>
    %11 = arith.mulf %8, %10 : vector<30x32xf32>
    %c1 = arith.constant 1 : index
    %c0_7 = arith.constant 0 : index
    %12 = vector.load %arg3[%c1, %c0_7] : memref<2x32xf32, #tpu.memory_space<vmem>>, vector<1x32xf32>
    %13 = vector.broadcast %12 : vector<1x32xf32> to vector<30x32xf32>
    %14 = arith.addf %11, %13 : vector<30x32xf32>
    %cst_8 = arith.constant 0.000000e+00 : f32
    %15 = vector.broadcast %cst_8 : f32 to vector<30x32xf32>
    %16 = arith.maximumf %14, %15 : vector<30x32xf32>
    %17 = vector.extract_strided_slice %16 {offsets = [0, 0], sizes = [26, 32], strides = [1, 1]} : vector<30x32xf32> to vector<26x32xf32>
    %18 = vector.extract_strided_slice %16 {offsets = [1, 0], sizes = [26, 32], strides = [1, 1]} : vector<30x32xf32> to vector<26x32xf32>
    %19 = vector.extract_strided_slice %16 {offsets = [2, 0], sizes = [26, 32], strides = [1, 1]} : vector<30x32xf32> to vector<26x32xf32>
    %20 = vector.extract_strided_slice %16 {offsets = [3, 0], sizes = [26, 32], strides = [1, 1]} : vector<30x32xf32> to vector<26x32xf32>
    %21 = vector.extract_strided_slice %16 {offsets = [4, 0], sizes = [26, 32], strides = [1, 1]} : vector<30x32xf32> to vector<26x32xf32>
    %22 = tpu.concatenate %17, %18, %19, %20, %21 in 1 : vector<26x32xf32>, vector<26x32xf32>, vector<26x32xf32>, vector<26x32xf32>, vector<26x32xf32> -> vector<26x160xf32>
    %23 = arith.truncf %22 : vector<26x160xf32> to vector<26x160xbf16>
    %c0_9 = arith.constant 0 : index
    %c0_10 = arith.constant 0 : index
    %24 = vector.load %arg4[%c0_9, %c0_10] : memref<160x32xbf16, #tpu.memory_space<vmem>>, vector<160x32xbf16>
    %cst_11 = arith.constant dense<0.000000e+00> : vector<26x32xf32>
    %25 = tpu.matmul %23, %24, %cst_11 {dimension_numbers = #tpu.dot_dimension_numbers<[1], [0], [0], [1], [0, 0, 1, 1], [], []>} : vector<26x160xbf16>, vector<160x32xbf16>, vector<26x32xf32> -> vector<26x32xf32>
    %c0_12 = arith.constant 0 : index
    %c0_13 = arith.constant 0 : index
    %26 = vector.load %arg5[%c0_12, %c0_13] : memref<2x32xf32, #tpu.memory_space<vmem>>, vector<1x32xf32>
    %27 = vector.broadcast %26 : vector<1x32xf32> to vector<26x32xf32>
    %28 = arith.mulf %25, %27 : vector<26x32xf32>
    %c1_14 = arith.constant 1 : index
    %c0_15 = arith.constant 0 : index
    %29 = vector.load %arg5[%c1_14, %c0_15] : memref<2x32xf32, #tpu.memory_space<vmem>>, vector<1x32xf32>
    %30 = vector.broadcast %29 : vector<1x32xf32> to vector<26x32xf32>
    %31 = arith.addf %28, %30 : vector<26x32xf32>
    %cst_16 = arith.constant 0.000000e+00 : f32
    %32 = vector.broadcast %cst_16 : f32 to vector<26x32xf32>
    %33 = arith.maximumf %31, %32 : vector<26x32xf32>
    %34 = vector.extract_strided_slice %33 {offsets = [0, 0], sizes = [24, 32], strides = [1, 1]} : vector<26x32xf32> to vector<24x32xf32>
    %35 = vector.extract_strided_slice %33 {offsets = [1, 0], sizes = [24, 32], strides = [1, 1]} : vector<26x32xf32> to vector<24x32xf32>
    %36 = vector.extract_strided_slice %33 {offsets = [2, 0], sizes = [24, 32], strides = [1, 1]} : vector<26x32xf32> to vector<24x32xf32>
    %37 = tpu.concatenate %34, %35, %36 in 1 : vector<24x32xf32>, vector<24x32xf32>, vector<24x32xf32> -> vector<24x96xf32>
    %38 = arith.truncf %37 : vector<24x96xf32> to vector<24x96xbf16>
    %c0_17 = arith.constant 0 : index
    %c0_18 = arith.constant 0 : index
    %39 = vector.load %arg6[%c0_17, %c0_18] : memref<96x64xbf16, #tpu.memory_space<vmem>>, vector<96x64xbf16>
    %cst_19 = arith.constant dense<0.000000e+00> : vector<24x64xf32>
    %40 = tpu.matmul %38, %39, %cst_19 {dimension_numbers = #tpu.dot_dimension_numbers<[1], [0], [0], [1], [0, 0, 1, 1], [], []>} : vector<24x96xbf16>, vector<96x64xbf16>, vector<24x64xf32> -> vector<24x64xf32>
    %c0_20 = arith.constant 0 : index
    %c0_21 = arith.constant 0 : index
    %41 = vector.load %arg7[%c0_20, %c0_21] : memref<2x64xf32, #tpu.memory_space<vmem>>, vector<1x64xf32>
    %42 = vector.broadcast %41 : vector<1x64xf32> to vector<24x64xf32>
    %43 = arith.mulf %40, %42 : vector<24x64xf32>
    %c1_22 = arith.constant 1 : index
    %c0_23 = arith.constant 0 : index
    %44 = vector.load %arg7[%c1_22, %c0_23] : memref<2x64xf32, #tpu.memory_space<vmem>>, vector<1x64xf32>
    %45 = vector.broadcast %44 : vector<1x64xf32> to vector<24x64xf32>
    %46 = arith.addf %43, %45 : vector<24x64xf32>
    %cst_24 = arith.constant 0.000000e+00 : f32
    %47 = vector.broadcast %cst_24 : f32 to vector<24x64xf32>
    %48 = arith.maximumf %46, %47 : vector<24x64xf32>
    %cst_25 = arith.constant dense<0.000000e+00> : vector<64xf32>
    %49 = vector.multi_reduction <add>, %48, %cst_25 [0] : vector<24x64xf32> to vector<64xf32>
    %50 = vector.shape_cast %49 : vector<64xf32> to vector<1x64xf32>
    %cst_26 = arith.constant 2.400000e+01 : f32
    %51 = vector.broadcast %cst_26 : f32 to vector<1x64xf32>
    %52 = arith.divf %50, %51 : vector<1x64xf32>
    %53 = vector.broadcast %52 : vector<1x64xf32> to vector<24x64xf32>
    %54 = arith.subf %48, %53 : vector<24x64xf32>
    %55 = arith.mulf %54, %54 : vector<24x64xf32>
    %cst_27 = arith.constant dense<0.000000e+00> : vector<64xf32>
    %56 = vector.multi_reduction <add>, %55, %cst_27 [0] : vector<24x64xf32> to vector<64xf32>
    %57 = vector.shape_cast %56 : vector<64xf32> to vector<1x64xf32>
    %cst_28 = arith.constant 2.300000e+01 : f32
    %58 = vector.broadcast %cst_28 : f32 to vector<1x64xf32>
    %59 = arith.divf %57, %58 : vector<1x64xf32>
    %c0_29 = arith.constant 0 : index
    %c1_30 = arith.constant 1 : index
    %c0_31 = arith.constant 0 : index
    %c0_32 = arith.constant 0 : index
    %60 = vector.load %arg1[%c0_29, %c1_30, %c0_31, %c0_32] : memref<1x2x32x16xf32, #tpu.memory_space<vmem>>, vector<1x1x32x16xf32>
    %61 = vector.shape_cast %60 : vector<1x1x32x16xf32> to vector<32x16xf32>
    %62 = vector.extract_strided_slice %61 {offsets = [0, 0], sizes = [30, 16], strides = [1, 1]} : vector<32x16xf32> to vector<30x16xf32>
    %63 = vector.extract_strided_slice %61 {offsets = [1, 0], sizes = [30, 16], strides = [1, 1]} : vector<32x16xf32> to vector<30x16xf32>
    %64 = vector.extract_strided_slice %61 {offsets = [2, 0], sizes = [30, 16], strides = [1, 1]} : vector<32x16xf32> to vector<30x16xf32>
    %65 = tpu.concatenate %62, %63, %64 in 1 : vector<30x16xf32>, vector<30x16xf32>, vector<30x16xf32> -> vector<30x48xf32>
    %66 = arith.truncf %65 : vector<30x48xf32> to vector<30x48xbf16>
    %c0_33 = arith.constant 0 : index
    %c0_34 = arith.constant 0 : index
    %67 = vector.load %arg2[%c0_33, %c0_34] : memref<48x32xbf16, #tpu.memory_space<vmem>>, vector<48x32xbf16>
    %cst_35 = arith.constant dense<0.000000e+00> : vector<30x32xf32>
    %68 = tpu.matmul %66, %67, %cst_35 {dimension_numbers = #tpu.dot_dimension_numbers<[1], [0], [0], [1], [0, 0, 1, 1], [], []>} : vector<30x48xbf16>, vector<48x32xbf16>, vector<30x32xf32> -> vector<30x32xf32>
    %c0_36 = arith.constant 0 : index
    %c0_37 = arith.constant 0 : index
    %69 = vector.load %arg3[%c0_36, %c0_37] : memref<2x32xf32, #tpu.memory_space<vmem>>, vector<1x32xf32>
    %70 = vector.broadcast %69 : vector<1x32xf32> to vector<30x32xf32>
    %71 = arith.mulf %68, %70 : vector<30x32xf32>
    %c1_38 = arith.constant 1 : index
    %c0_39 = arith.constant 0 : index
    %72 = vector.load %arg3[%c1_38, %c0_39] : memref<2x32xf32, #tpu.memory_space<vmem>>, vector<1x32xf32>
    %73 = vector.broadcast %72 : vector<1x32xf32> to vector<30x32xf32>
    %74 = arith.addf %71, %73 : vector<30x32xf32>
    %cst_40 = arith.constant 0.000000e+00 : f32
    %75 = vector.broadcast %cst_40 : f32 to vector<30x32xf32>
    %76 = arith.maximumf %74, %75 : vector<30x32xf32>
    %77 = vector.extract_strided_slice %76 {offsets = [0, 0], sizes = [26, 32], strides = [1, 1]} : vector<30x32xf32> to vector<26x32xf32>
    %78 = vector.extract_strided_slice %76 {offsets = [1, 0], sizes = [26, 32], strides = [1, 1]} : vector<30x32xf32> to vector<26x32xf32>
    %79 = vector.extract_strided_slice %76 {offsets = [2, 0], sizes = [26, 32], strides = [1, 1]} : vector<30x32xf32> to vector<26x32xf32>
    %80 = vector.extract_strided_slice %76 {offsets = [3, 0], sizes = [26, 32], strides = [1, 1]} : vector<30x32xf32> to vector<26x32xf32>
    %81 = vector.extract_strided_slice %76 {offsets = [4, 0], sizes = [26, 32], strides = [1, 1]} : vector<30x32xf32> to vector<26x32xf32>
    %82 = tpu.concatenate %77, %78, %79, %80, %81 in 1 : vector<26x32xf32>, vector<26x32xf32>, vector<26x32xf32>, vector<26x32xf32>, vector<26x32xf32> -> vector<26x160xf32>
    %83 = arith.truncf %82 : vector<26x160xf32> to vector<26x160xbf16>
    %c0_41 = arith.constant 0 : index
    %c0_42 = arith.constant 0 : index
    %84 = vector.load %arg4[%c0_41, %c0_42] : memref<160x32xbf16, #tpu.memory_space<vmem>>, vector<160x32xbf16>
    %cst_43 = arith.constant dense<0.000000e+00> : vector<26x32xf32>
    %85 = tpu.matmul %83, %84, %cst_43 {dimension_numbers = #tpu.dot_dimension_numbers<[1], [0], [0], [1], [0, 0, 1, 1], [], []>} : vector<26x160xbf16>, vector<160x32xbf16>, vector<26x32xf32> -> vector<26x32xf32>
    %c0_44 = arith.constant 0 : index
    %c0_45 = arith.constant 0 : index
    %86 = vector.load %arg5[%c0_44, %c0_45] : memref<2x32xf32, #tpu.memory_space<vmem>>, vector<1x32xf32>
    %87 = vector.broadcast %86 : vector<1x32xf32> to vector<26x32xf32>
    %88 = arith.mulf %85, %87 : vector<26x32xf32>
    %c1_46 = arith.constant 1 : index
    %c0_47 = arith.constant 0 : index
    %89 = vector.load %arg5[%c1_46, %c0_47] : memref<2x32xf32, #tpu.memory_space<vmem>>, vector<1x32xf32>
    %90 = vector.broadcast %89 : vector<1x32xf32> to vector<26x32xf32>
    %91 = arith.addf %88, %90 : vector<26x32xf32>
    %cst_48 = arith.constant 0.000000e+00 : f32
    %92 = vector.broadcast %cst_48 : f32 to vector<26x32xf32>
    %93 = arith.maximumf %91, %92 : vector<26x32xf32>
    %94 = vector.extract_strided_slice %93 {offsets = [0, 0], sizes = [24, 32], strides = [1, 1]} : vector<26x32xf32> to vector<24x32xf32>
    %95 = vector.extract_strided_slice %93 {offsets = [1, 0], sizes = [24, 32], strides = [1, 1]} : vector<26x32xf32> to vector<24x32xf32>
    %96 = vector.extract_strided_slice %93 {offsets = [2, 0], sizes = [24, 32], strides = [1, 1]} : vector<26x32xf32> to vector<24x32xf32>
    %97 = tpu.concatenate %94, %95, %96 in 1 : vector<24x32xf32>, vector<24x32xf32>, vector<24x32xf32> -> vector<24x96xf32>
    %98 = arith.truncf %97 : vector<24x96xf32> to vector<24x96xbf16>
    %c0_49 = arith.constant 0 : index
    %c0_50 = arith.constant 0 : index
    %99 = vector.load %arg6[%c0_49, %c0_50] : memref<96x64xbf16, #tpu.memory_space<vmem>>, vector<96x64xbf16>
    %cst_51 = arith.constant dense<0.000000e+00> : vector<24x64xf32>
    %100 = tpu.matmul %98, %99, %cst_51 {dimension_numbers = #tpu.dot_dimension_numbers<[1], [0], [0], [1], [0, 0, 1, 1], [], []>} : vector<24x96xbf16>, vector<96x64xbf16>, vector<24x64xf32> -> vector<24x64xf32>
    %c0_52 = arith.constant 0 : index
    %c0_53 = arith.constant 0 : index
    %101 = vector.load %arg7[%c0_52, %c0_53] : memref<2x64xf32, #tpu.memory_space<vmem>>, vector<1x64xf32>
    %102 = vector.broadcast %101 : vector<1x64xf32> to vector<24x64xf32>
    %103 = arith.mulf %100, %102 : vector<24x64xf32>
    %c1_54 = arith.constant 1 : index
    %c0_55 = arith.constant 0 : index
    %104 = vector.load %arg7[%c1_54, %c0_55] : memref<2x64xf32, #tpu.memory_space<vmem>>, vector<1x64xf32>
    %105 = vector.broadcast %104 : vector<1x64xf32> to vector<24x64xf32>
    %106 = arith.addf %103, %105 : vector<24x64xf32>
    %cst_56 = arith.constant 0.000000e+00 : f32
    %107 = vector.broadcast %cst_56 : f32 to vector<24x64xf32>
    %108 = arith.maximumf %106, %107 : vector<24x64xf32>
    %cst_57 = arith.constant dense<0.000000e+00> : vector<64xf32>
    %109 = vector.multi_reduction <add>, %108, %cst_57 [0] : vector<24x64xf32> to vector<64xf32>
    %110 = vector.shape_cast %109 : vector<64xf32> to vector<1x64xf32>
    %cst_58 = arith.constant 2.400000e+01 : f32
    %111 = vector.broadcast %cst_58 : f32 to vector<1x64xf32>
    %112 = arith.divf %110, %111 : vector<1x64xf32>
    %113 = vector.broadcast %112 : vector<1x64xf32> to vector<24x64xf32>
    %114 = arith.subf %108, %113 : vector<24x64xf32>
    %115 = arith.mulf %114, %114 : vector<24x64xf32>
    %cst_59 = arith.constant dense<0.000000e+00> : vector<64xf32>
    %116 = vector.multi_reduction <add>, %115, %cst_59 [0] : vector<24x64xf32> to vector<64xf32>
    %117 = vector.shape_cast %116 : vector<64xf32> to vector<1x64xf32>
    %cst_60 = arith.constant 2.300000e+01 : f32
    %118 = vector.broadcast %cst_60 : f32 to vector<1x64xf32>
    %119 = arith.divf %117, %118 : vector<1x64xf32>
    %120 = tpu.concatenate %52, %112 in 0 : vector<1x64xf32>, vector<1x64xf32> -> vector<2x64xf32>
    %121 = tpu.concatenate %59, %119 in 0 : vector<1x64xf32>, vector<1x64xf32> -> vector<2x64xf32>
    %c0_61 = arith.constant 0 : index
    %c0_62 = arith.constant 0 : index
    %122 = vector.load %arg8[%c0_61, %c0_62] : memref<128x64xbf16, #tpu.memory_space<vmem>>, vector<128x64xbf16>
    %123 = arith.truncf %120 : vector<2x64xf32> to vector<2x64xbf16>
    %124 = vector.extract_strided_slice %122 {offsets = [0, 0], sizes = [64, 64], strides = [1, 1]} : vector<128x64xbf16> to vector<64x64xbf16>
    %cst_63 = arith.constant dense<0.000000e+00> : vector<2x64xf32>
    %125 = tpu.matmul %123, %124, %cst_63 {dimension_numbers = #tpu.dot_dimension_numbers<[1], [0], [0], [1], [0, 0, 1, 1], [], []>} : vector<2x64xbf16>, vector<64x64xbf16>, vector<2x64xf32> -> vector<2x64xf32>
    %126 = arith.truncf %121 : vector<2x64xf32> to vector<2x64xbf16>
    %127 = vector.extract_strided_slice %122 {offsets = [64, 0], sizes = [64, 64], strides = [1, 1]} : vector<128x64xbf16> to vector<64x64xbf16>
    %cst_64 = arith.constant dense<0.000000e+00> : vector<2x64xf32>
    %128 = tpu.matmul %126, %127, %cst_64 {dimension_numbers = #tpu.dot_dimension_numbers<[1], [0], [0], [1], [0, 0, 1, 1], [], []>} : vector<2x64xbf16>, vector<64x64xbf16>, vector<2x64xf32> -> vector<2x64xf32>
    %129 = arith.addf %125, %128 : vector<2x64xf32>
    %c0_65 = arith.constant 0 : index
    %c0_66 = arith.constant 0 : index
    %130 = vector.load %arg9[%c0_65, %c0_66] : memref<3x64xf32, #tpu.memory_space<vmem>>, vector<1x64xf32>
    %131 = vector.broadcast %130 : vector<1x64xf32> to vector<2x64xf32>
    %132 = arith.addf %129, %131 : vector<2x64xf32>
    %c0_67 = arith.constant 0 : index
    %c0_68 = arith.constant 0 : index
    %c0_69 = arith.constant 0 : index
    %133 = vector.load %arg14[%c0_67, %c0_68, %c0_69] : memref<1x2x64xf32, #tpu.memory_space<vmem>>, vector<1x2x64xf32>
    %134 = vector.shape_cast %133 : vector<1x2x64xf32> to vector<2x64xf32>
    %135 = vector.shape_cast %132 : vector<2x64xf32> to vector<1x2x64xf32>
    tpu.vector_store %arg14[%c0_67, %c0_68, %c0_69], %135 {strides = array<i32>} : memref<1x2x64xf32, #tpu.memory_space<vmem>>, vector<1x2x64xf32>,
    %c1_70 = arith.constant 1 : index
    %c0_71 = arith.constant 0 : index
    %136 = vector.load %arg9[%c1_70, %c0_71] : memref<3x64xf32, #tpu.memory_space<vmem>>, vector<1x64xf32>
    %137 = vector.broadcast %136 : vector<1x64xf32> to vector<2x64xf32>
    %138 = arith.mulf %132, %137 : vector<2x64xf32>
    %c2 = arith.constant 2 : index
    %c0_72 = arith.constant 0 : index
    %139 = vector.load %arg9[%c2, %c0_72] : memref<3x64xf32, #tpu.memory_space<vmem>>, vector<1x64xf32>
    %140 = vector.broadcast %139 : vector<1x64xf32> to vector<2x64xf32>
    %141 = arith.addf %138, %140 : vector<2x64xf32>
    %cst_73 = arith.constant 0.000000e+00 : f32
    %142 = vector.broadcast %cst_73 : f32 to vector<2x64xf32>
    %143 = arith.maximumf %141, %142 : vector<2x64xf32>
    %144 = arith.truncf %143 : vector<2x64xf32> to vector<2x64xbf16>
    %c0_74 = arith.constant 0 : index
    %c0_75 = arith.constant 0 : index
    %145 = vector.load %arg10[%c0_74, %c0_75] : memref<64x32xbf16, #tpu.memory_space<vmem>>, vector<64x32xbf16>
    %cst_76 = arith.constant dense<0.000000e+00> : vector<2x32xf32>
    %146 = tpu.matmul %144, %145, %cst_76 {dimension_numbers = #tpu.dot_dimension_numbers<[1], [0], [0], [1], [0, 0, 1, 1], [], []>} : vector<2x64xbf16>, vector<64x32xbf16>, vector<2x32xf32> -> vector<2x32xf32>
    %c0_77 = arith.constant 0 : index
    %c0_78 = arith.constant 0 : index
    %147 = vector.load %arg11[%c0_77, %c0_78] : memref<3x32xf32, #tpu.memory_space<vmem>>, vector<1x32xf32>
    %148 = vector.broadcast %147 : vector<1x32xf32> to vector<2x32xf32>
    %149 = arith.addf %146, %148 : vector<2x32xf32>
    %c0_79 = arith.constant 0 : index
    %c0_80 = arith.constant 0 : index
    %c0_81 = arith.constant 0 : index
    %150 = vector.load %arg15[%c0_79, %c0_80, %c0_81] : memref<1x2x32xf32, #tpu.memory_space<vmem>>, vector<1x2x32xf32>
    %151 = vector.shape_cast %150 : vector<1x2x32xf32> to vector<2x32xf32>
    %152 = vector.shape_cast %149 : vector<2x32xf32> to vector<1x2x32xf32>
    tpu.vector_store %arg15[%c0_79, %c0_80, %c0_81], %152 {strides = array<i32>} : memref<1x2x32xf32, #tpu.memory_space<vmem>>, vector<1x2x32xf32>,
    %c1_82 = arith.constant 1 : index
    %c0_83 = arith.constant 0 : index
    %153 = vector.load %arg11[%c1_82, %c0_83] : memref<3x32xf32, #tpu.memory_space<vmem>>, vector<1x32xf32>
    %154 = vector.broadcast %153 : vector<1x32xf32> to vector<2x32xf32>
    %155 = arith.mulf %149, %154 : vector<2x32xf32>
    %c2_84 = arith.constant 2 : index
    %c0_85 = arith.constant 0 : index
    %156 = vector.load %arg11[%c2_84, %c0_85] : memref<3x32xf32, #tpu.memory_space<vmem>>, vector<1x32xf32>
    %157 = vector.broadcast %156 : vector<1x32xf32> to vector<2x32xf32>
    %158 = arith.addf %155, %157 : vector<2x32xf32>
    %cst_86 = arith.constant 0.000000e+00 : f32
    %159 = vector.broadcast %cst_86 : f32 to vector<2x32xf32>
    %160 = arith.maximumf %158, %159 : vector<2x32xf32>
    %161 = arith.truncf %160 : vector<2x32xf32> to vector<2x32xbf16>
    %c0_87 = arith.constant 0 : index
    %c0_88 = arith.constant 0 : index
    %162 = vector.load %arg12[%c0_87, %c0_88] : memref<32x16xbf16, #tpu.memory_space<vmem>>, vector<32x16xbf16>
    %cst_89 = arith.constant dense<0.000000e+00> : vector<2x16xf32>
    %163 = tpu.matmul %161, %162, %cst_89 {dimension_numbers = #tpu.dot_dimension_numbers<[1], [0], [0], [1], [0, 0, 1, 1], [], []>} : vector<2x32xbf16>, vector<32x16xbf16>, vector<2x16xf32> -> vector<2x16xf32>
    %c0_90 = arith.constant 0 : index
    %c0_91 = arith.constant 0 : index
    %164 = vector.load %arg13[%c0_90, %c0_91] : memref<1x16xf32, #tpu.memory_space<vmem>>, vector<1x16xf32>
    %165 = vector.broadcast %164 : vector<1x16xf32> to vector<2x16xf32>
    %166 = arith.addf %163, %165 : vector<2x16xf32>
    %cst_92 = arith.constant dense<0xFF800000> : vector<2xf32>
    %167 = vector.multi_reduction <maximumf>, %166, %cst_92 [1] : vector<2x16xf32> to vector<2xf32>
    %168 = vector.shape_cast %167 : vector<2xf32> to vector<2x1xf32>
    %169 = vector.broadcast %168 : vector<2x1xf32> to vector<2x16xf32>
    %170 = arith.subf %166, %169 : vector<2x16xf32>
    %171 = math.exp %170 : vector<2x16xf32>
    %cst_93 = arith.constant dense<0.000000e+00> : vector<2xf32>
    %172 = vector.multi_reduction <add>, %171, %cst_93 [1] : vector<2x16xf32> to vector<2xf32>
    %173 = vector.shape_cast %172 : vector<2xf32> to vector<2x1xf32>
    %174 = math.log %173 : vector<2x1xf32>
    %175 = vector.broadcast %174 : vector<2x1xf32> to vector<2x16xf32>
    %176 = arith.subf %170, %175 : vector<2x16xf32>
    %c0_94 = arith.constant 0 : index
    %c0_95 = arith.constant 0 : index
    %c0_96 = arith.constant 0 : index
    %177 = vector.load %arg16[%c0_94, %c0_95, %c0_96] : memref<1x2x16xf32, #tpu.memory_space<vmem>>, vector<1x2x16xf32>
    %178 = vector.shape_cast %177 : vector<1x2x16xf32> to vector<2x16xf32>
    %179 = vector.shape_cast %176 : vector<2x16xf32> to vector<1x2x16xf32>
    tpu.vector_store %arg16[%c0_94, %c0_95, %c0_96], %179 {strides = array<i32>} : memref<1x2x16xf32, #tpu.memory_space<vmem>>, vector<1x2x16xf32>,
    return
  }
  func.func @transform_0(%arg0: i32) -> (i32, i32, i32, i32) {
    %c0_i32 = arith.constant 0 : i32
    %c0_i32_0 = arith.constant 0 : i32
    %c0_i32_1 = arith.constant 0 : i32
    %c0_i32_2 = arith.constant 0 : i32
    return %arg0, %c0_i32, %c0_i32_0, %c0_i32_1 : i32, i32, i32, i32
  }
  func.func @transform_1(%arg0: i32) -> (i32, i32) {
    %c0_i32 = arith.constant 0 : i32
    %c0_i32_0 = arith.constant 0 : i32
    %c0_i32_1 = arith.constant 0 : i32
    return %c0_i32, %c0_i32_0 : i32, i32
  }
  func.func @transform_2(%arg0: i32) -> (i32, i32) {
    %c0_i32 = arith.constant 0 : i32
    %c0_i32_0 = arith.constant 0 : i32
    %c0_i32_1 = arith.constant 0 : i32
    return %c0_i32, %c0_i32_0 : i32, i32
  }
  func.func @transform_3(%arg0: i32) -> (i32, i32) {
    %c0_i32 = arith.constant 0 : i32
    %c0_i32_0 = arith.constant 0 : i32
    %c0_i32_1 = arith.constant 0 : i32
    return %c0_i32, %c0_i32_0 : i32, i32
  }
  func.func @transform_4(%arg0: i32) -> (i32, i32) {
    %c0_i32 = arith.constant 0 : i32
    %c0_i32_0 = arith.constant 0 : i32
    %c0_i32_1 = arith.constant 0 : i32
    return %c0_i32, %c0_i32_0 : i32, i32
  }
  func.func @transform_5(%arg0: i32) -> (i32, i32) {
    %c0_i32 = arith.constant 0 : i32
    %c0_i32_0 = arith.constant 0 : i32
    %c0_i32_1 = arith.constant 0 : i32
    return %c0_i32, %c0_i32_0 : i32, i32
  }
  func.func @transform_6(%arg0: i32) -> (i32, i32) {
    %c0_i32 = arith.constant 0 : i32
    %c0_i32_0 = arith.constant 0 : i32
    %c0_i32_1 = arith.constant 0 : i32
    return %c0_i32, %c0_i32_0 : i32, i32
  }
  func.func @transform_7(%arg0: i32) -> (i32, i32) {
    %c0_i32 = arith.constant 0 : i32
    %c0_i32_0 = arith.constant 0 : i32
    %c0_i32_1 = arith.constant 0 : i32
    return %c0_i32, %c0_i32_0 : i32, i32
  }
  func.func @transform_8(%arg0: i32) -> (i32, i32) {
    %c0_i32 = arith.constant 0 : i32
    %c0_i32_0 = arith.constant 0 : i32
    %c0_i32_1 = arith.constant 0 : i32
    return %c0_i32, %c0_i32_0 : i32, i32
  }
  func.func @transform_9(%arg0: i32) -> (i32, i32) {
    %c0_i32 = arith.constant 0 : i32
    %c0_i32_0 = arith.constant 0 : i32
    %c0_i32_1 = arith.constant 0 : i32
    return %c0_i32, %c0_i32_0 : i32, i32
  }
  func.func @transform_10(%arg0: i32) -> (i32, i32) {
    %c0_i32 = arith.constant 0 : i32
    %c0_i32_0 = arith.constant 0 : i32
    %c0_i32_1 = arith.constant 0 : i32
    return %c0_i32, %c0_i32_0 : i32, i32
  }
  func.func @transform_11(%arg0: i32) -> (i32, i32) {
    %c0_i32 = arith.constant 0 : i32
    %c0_i32_0 = arith.constant 0 : i32
    %c0_i32_1 = arith.constant 0 : i32
    return %c0_i32, %c0_i32_0 : i32, i32
  }
  func.func @transform_12(%arg0: i32) -> (i32, i32) {
    %c0_i32 = arith.constant 0 : i32
    %c0_i32_0 = arith.constant 0 : i32
    %c0_i32_1 = arith.constant 0 : i32
    return %c0_i32, %c0_i32_0 : i32, i32
  }
  func.func @transform_13(%arg0: i32) -> (i32, i32, i32) {
    %c0_i32 = arith.constant 0 : i32
    %c0_i32_0 = arith.constant 0 : i32
    %c0_i32_1 = arith.constant 0 : i32
    return %arg0, %c0_i32, %c0_i32_0 : i32, i32, i32
  }
  func.func @transform_14(%arg0: i32) -> (i32, i32, i32) {
    %c0_i32 = arith.constant 0 : i32
    %c0_i32_0 = arith.constant 0 : i32
    %c0_i32_1 = arith.constant 0 : i32
    return %arg0, %c0_i32, %c0_i32_0 : i32, i32, i32
  }
  func.func @transform_15(%arg0: i32) -> (i32, i32, i32) {
    %c0_i32 = arith.constant 0 : i32
    %c0_i32_0 = arith.constant 0 : i32
    %c0_i32_1 = arith.constant 0 : i32
    return %arg0, %c0_i32, %c0_i32_0 : i32, i32, i32
  }
}

</mosaic_0001>

<bundles_post_ra>
// kernel: tpu_custom_call.1
= control target key start
LH: loop header
LB: loop body
LE: loop exit
PB: predicated region body
PF: predicated region fallthrough
CT: control target
= control target key end

     0   :  { %s3473_s0 = inlined_call_operand.vmem [shape: f32[2,2,32,16], index: 0, kind: input, shape index: {}]   ;;  %s3474_s1 = inlined_call_operand.vmem [shape: bf16[48,32], index: 1, kind: input, shape index: {}]   ;;  %s3475_s2 = inlined_call_operand.vmem [shape: f32[2,32], index: 2, kind: input, shape index: {}]   ;;  %s3476_s3 = inlined_call_operand.vmem [shape: bf16[160,32], index: 3, kind: input, shape index: {}]   ;;  %s3477_s4 = inlined_call_operand.vmem [shape: f32[2,32], index: 4, kind: input, shape index: {}]   ;;  %s3478_s5 = inlined_call_operand.vmem [shape: bf16[96,64], index: 5, kind: input, shape index: {}]   ;;  %s3479_s6 = inlined_call_operand.vmem [shape: f32[2,64], index: 6, kind: input, shape index: {}]   ;;  %s3480_s7 = inlined_call_operand.vmem [shape: bf16[128,64], index: 7, kind: input, shape index: {}]   ;;  %s3481_s8 = inlined_call_operand.vmem [shape: f32[3,64], index: 8, kind: input, shape index: {}]   ;;  %s3482_s9 = inlined_call_operand.vmem [shape: bf16[64,32], index: 9, kind: input, shape index: {}]   ;;  %s3483_s10 = inlined_call_operand.vmem [shape: f32[3,32], index: 10, kind: input, shape index: {}]   ;;  %s3484_s11 = inlined_call_operand.vmem [shape: bf16[32,16], index: 11, kind: input, shape index: {}]   ;;  %s3485_s12 = inlined_call_operand.vmem [shape: f32[1,16], index: 12, kind: input, shape index: {}]   ;;  %s3486_s13 = inlined_call_operand.hbm [shape: f32[2,2,64], index: 13, kind: output, shape index: {0}]   ;;  %s3487_s14 = inlined_call_operand.hbm [shape: f32[2,2,32], index: 14, kind: output, shape index: {1}]   ;;  %s3488_s15 = inlined_call_operand.hbm [shape: f32[2,2,16], index: 15, kind: output, shape index: {2}]  }
   0x1   :  { %3499 = sst [smem:[#allocation12_spill]] %s3473_s0 }
   0x2   :  { %3500 = sst [smem:[#allocation13_spill]] %s3474_s1 }
   0x3   :  { %3501 = sst [smem:[#allocation14_spill]] %s3475_s2 }
   0x4   :  { %3502 = sst [smem:[#allocation15_spill]] %s3476_s3 }
   0x5   :  { %3503 = sst [smem:[#allocation16_spill]] %s3477_s4 }
   0x6   :  { %21 = vsyncpa [#allocation3], 0 }
   0x7   :  { %23 = vsyncpa [#allocation3 + $0x1], 0 }
   0x8   :  { %24 = vsyncpa [#allocation5], 0 }
   0x9   :  { %26 = vsyncpa [#allocation5 + $0x1], 0  ;;  %s2704_s18 = smov 0   ;;  %s2706_s19 = smov 0  }
   0xa   :  { %s2708_s20 = smov 0   ;;  %s2710_s21 = smov 0  }
   0xb LB: > { %3504 = sst [smem:[#allocation9_spill]] %s2608_s20  ;;  %s2725_s22 = sadd.s32 4294967295, %s2612_s21   ;;  %s2612_s21 = sphi %s2710_s21, %s3519_s21   ;;  %s2608_s20 = sphi %s2708_s20, %s3521_s20   ;;  %s2604_s19 = sphi %s2706_s19, %s3523_s19   ;;  %s2600_s18 = sphi %s2704_s18, %s3522_s18  }
   0xc   : > { %s3489_s23 = sadd.s32 4294967294, %s2612_s21   ;;  %s2729_s24 = sadd.s32 1, %s2612_s21  }
   0xd   : > { %3505 = sst [smem:[#allocation10_spill]] %s2729_s24  ;;  %s317_s25 = sadd.s32 1, %s2608_s20 }
   0xe   : > { %s314_s26 = ssub.s32 %s2612_s21, %s2729_s24  ;;  %p327_p0 = scmp.ne.s32.totalorder %s2608_s20, %s2604_s19 }
   0xf   : > { %p315_p1 = scmp.eq.s32.totalorder %s314_s26, 0  ;;  %p328_p2 = scmp.eq.s32.totalorder %s2725_s22, 1 }
  0x10   : > { %p333_p3 = scmp.ne.s32.totalorder %s2604_s19, %s2600_s18  ;;  %p334_p4 = scmp.eq.s32.totalorder %s3489_s23, 1 }
  0x11   : > { %s2742_s27 = scalar_select %p315_p1, %s2608_s20, %s317_s25  }
  0x12   : > { %p2744_p5 = por %p328_p2, %p327_p0  ;;  %p2748_p6 = por %p334_p4, %p333_p3 }
  0x13   : > { %3506 = sst [smem:[#allocation11_spill]] %s2742_s27  ;;  %p2062_p7 = scmp.ge.s32.totalorder %s2612_s21, 1 }
  0x14   : > { %p448_p8 = scmp.lt.s32.totalorder %s2612_s21, 3 }
  0x16   : > { %p449_p9 = pnand %p2062_p7, %p448_p8 }
  0x17   : > { %p506_p10 = scmp.lt.s32.totalorder (!%p449_p9), %s2725_s22, 1  ;;  %s3509_s1 = sld [smem:[#allocation13_spill]] (!%p449_p9) }
  0x18   : > { %452 = sbr.rel (%p449_p9) target bundleno = 2701 (0xa8d), region = 72  ;;  %s3510_s0 = sld [smem:[#allocation12_spill]] (!%p449_p9) }
  0x19   : > { %s3495_s20 = smov (!%p449_p9), 16   ;;  %s3511_s3 = sld [smem:[#allocation15_spill]] (!%p449_p9) }
  0x1a   : > { %s3512_s2 = sld [smem:[#allocation14_spill]] (!%p449_p9)  ;;  %s2617_s24 = smov (!%p449_p9), 64  }
  0x1b   : > { %s3493_s27 = smov (!%p449_p9), 96   ;;  %s3513_s4 = sld [smem:[#allocation16_spill]] (!%p449_p9) }
  0x1c   : > { %s3515_s26 = smov (!%p449_p9), 96  }
  0x1d   : > { %v2758_v0 = vld [vmem:[%s3509_s1 + $0x10] sm:$0xff]   ;;  %s507_s17 = scalar_select %p506_p10, %s2725_s22, 1  ;;  %v2764_v1 = vld [vmem:[%s3509_s1 + $0x8] sm:$0xff]   ;;  %v2771_v2 = vld [vmem:[%s3509_s1] sm:$0xff]   ;;  %vm520_vm0 = vcmask 1046528   ;;  %vm540_vm1 = vcmask 1045504  }
  0x1e   : > { %2187 = vmatprep.subr.bf16.mxu0 %v2758_v0  ;;  %vm560_vm2 = vcmask 130048   ;;  %vm565_vm3 = vcmask 261120   ;;  %vm596_vm4 = vcmask 392192   ;;  %v2616_v48 = vmov 0  }
  0x1f   : > { %s2142_s23 = sshll.u32 %s507_s17, 6  ;;  %2188 = vmatpush3.bf16.msra.mxu0 %v2758_v0  ;;  %v2809_v47 = vld [vmem:[%s3511_s3 + $0x38] sm:$0xff]   ;;  %852 = vmatprep.subr.bf16.mxu1 %v2616_v48  ;;  %v2816_v49 = vld [vmem:[%s3511_s3 + $0x30] sm:$0xff]   ;;  %v2823_v50 = vld [vmem:[%s3511_s3 + $0x28] sm:$0xff]   ;;  %vm736_vm5 = vcmask 1043456   ;;  %vm716_vm6 = vcmask 1044480  }
  0x20   : > { %s2776_s16 = scalar_lea.vmem %s3510_s0, %s2142_s23  ;;  %2189 = vmatprep.subr.bf16.mxu0 %v2764_v1  ;;  %s2615_s23 = smov 32   ;;  %853 = vmatpush1.bf16.msra.mxu1 %v2809_v47  ;;  %v2830_v51 = vld [vmem:[%s3511_s3 + $0x20] sm:$0xff]   ;;  %v2837_v52 = vld [vmem:[%s3511_s3 + $0x18] sm:$0xff]   ;;  %v2844_v53 = vld [vmem:[%s3511_s3 + $0x10] sm:$0xff]   ;;  %vm752_vm7 = vcmask 523264   ;;  %vm757_vm8 = vcmask 785408  }
  0x21   : > { %v512_v3 = vld [vmem:[%s2776_s16] sm:$0xff]  ;;  %v513_v4 = vld [vmem:[%s2776_s16 + $0x8] sm:$0xff]  ;;  %v514_v5 = vld [vmem:[%s2776_s16 + $0x10] sm:$0xff]  ;;  %854 = vmatprep.subr.bf16.mxu1 %v2616_v48  ;;  %vm2620_vm9 = vmmov 0   ;;  %vm1536_vm10 = vcmask 1040384   ;;  %s3497_s17 = sand.u32 1, %s2604_s19  }
  0x22   : > { %v521_v6 = vrot.slane %v512_v3, 1  ;;  %v522_v7 = vrot.slane %v513_v4, 1  ;;  %v524_v8 = vrot.slane %v514_v5, 1  ;;  %v541_v9 = vrot.slane %v512_v3, 2  ;;  %v515_v10 = vld [vmem:[%s2776_s16 + $0x18] sm:$0xff]  ;;  %v2851_v54 = vld [vmem:[%s3511_s3 + $0x8] sm:$0xff]  }
  0x23   : > { %v542_v11 = vrot.slane %v513_v4, 2  ;;  %v544_v12 = vrot.slane %v514_v5, 2  ;;  %v526_v13 = vrot.slane %v515_v10, 1  ;;  %v546_v14 = vrot.slane %v515_v10, 2  ;;  %2190 = vmatpush3.bf16.msra.mxu0 %v2764_v1  ;;  %v2858_v55 = vld [vmem:[%s3511_s3] sm:$0xff]   ;;  %s3338_s25 = sshll.u32 %s3497_s17, 1 }
  0x24   : > { %v523_v15 = vsel %vm520_vm0, %v521_v6, %v522_v7  ;;  %v525_v16 = vsel %vm520_vm0, %v522_v7, %v524_v8  ;;  %2191 = vmatprep.subr.bf16.mxu0 %v2771_v2  ;;  %855 = vmatpush1.bf16.msra.mxu1 %v2816_v49  ;;  %v2866_v56 = vld [vmem:[%s3512_s2] ss:$0 sm:$0xff]  ;;  %v2871_v58 = vld [vmem:[%s3512_s2 + $0x1] ss:$0 sm:$0xff]  ;;  %vm1697_vm11 = vcmask 517120   ;;  %s3498_s30 = scalar_lea.vmem [#allocation2], %s3338_s25 }
  0x25   : > { %v2339_v17 = vpack.i.bf16 %v525_v16, %v523_v15  ;;  %v543_v18 = vsel %vm540_vm1, %v541_v9, %v542_v11  ;;  %v545_v19 = vsel %vm540_vm1, %v542_v11, %v544_v12  ;;  %v527_v20 = vsel %vm520_vm0, %v524_v8, %v526_v13  ;;  %856 = vmatprep.subr.bf16.mxu1 %v2616_v48  ;;  %v2898_v15 = vld [vmem:[%s3511_s3 + $0x40] sm:$0xff]  }
  0x26   : > { %v2349_v21 = vpack.i.bf16 %v545_v19, %v543_v18  ;;  %v547_v22 = vsel %vm540_vm1, %v544_v12, %v546_v14  ;;  %v2344_v23 = vpack.i.bf16 %v526_v13, %v527_v20  ;;  %vm1793_vm12 = vcmask 254976  }
  0x27   : > { %2340 = vrot.lane.b32.xlu0 %v2339_v17, %s3495_s20  ;;  %2192 = vmatpush3.bf16.msra.mxu0 %v2771_v2  ;;  %v2354_v24 = vpack.i.bf16 %v546_v14, %v547_v22  ;;  %vm1875_vm13 = vcmask 123904  }
  0x28   : > { %2350 = vrot.lane.b32.xlu1 %v2349_v21, %s2615_s23  ;;  %857 = vmatpush1.bf16.msra.mxu1 %v2823_v50 }
  0x29   : > { %858 = vmatprep.subr.bf16.mxu1 %v2616_v48 }
  0x2b   : > { %2345 = vrot.lane.b32.xlu0 %v2344_v23, %s3495_s20 }
  0x2c   : > { %2355 = vrot.lane.b32.xlu1 %v2354_v24, %s2615_s23  ;;  %859 = vmatpush1.bf16.msra.mxu1 %v2830_v51 }
  0x2d   : > { %860 = vmatprep.subr.bf16.mxu1 %v2616_v48 }
  0x30   : > { %861 = vmatpush1.bf16.msra.mxu1 %v2837_v52 }
  0x31   : > { %862 = vmatprep.subr.bf16.mxu1 %v2616_v48 }
  0x34   : > { %863 = vmatpush1.bf16.msra.mxu1 %v2844_v53 }
  0x35   : > { %864 = vmatprep.subr.bf16.mxu1 %v2616_v48 }
  0x38   : > { %865 = vmatpush1.bf16.msra.mxu1 %v2851_v54 }
  0x39   : > { %866 = vmatprep.subr.bf16.mxu1 %v2616_v48 }
  0x3c   : > { %867 = vmatpush1.bf16.msra.mxu1 %v2858_v55 }
  0x3d   : > { %880 = vmatprep.subr.bf16.mxu1 %v2616_v48 }
  0x99   : > { %v2341_v25 = vpop.permute.xlu0 %2340 }
  0x9a   : > { %v2343_v26 = vunpack.i.h.bf16 %v2341_v25  ;;  %v2342_v27 = vunpack.i.l.bf16 %v2341_v25  ;;  %v2351_v28 = vpop.permute.xlu1 %2350 }
  0x9b   : > { %v2353_v29 = vunpack.i.h.bf16 %v2351_v28  ;;  %v2352_v30 = vunpack.i.l.bf16 %v2351_v28 }
  0x9c   : > { %v561_v31 = vsel %vm560_vm2, %v512_v3, %v2342_v27  ;;  %v562_v32 = vsel %vm560_vm2, %v513_v4, %v2343_v26 }
  0x9d   : > { %v2346_v33 = vpop.permute.xlu0 %2345  ;;  %v566_v34 = vsel %vm565_vm3, %v561_v31, %v2352_v30  ;;  %v567_v35 = vsel %vm565_vm3, %v562_v32, %v2353_v29 }
  0x9e   : > { %v2348_v36 = vunpack.i.h.bf16 %v2346_v33  ;;  %v2347_v37 = vunpack.i.l.bf16 %v2346_v33  ;;  %v2356_v38 = vpop.permute.xlu1 %2355  ;;  %v570_v39 = vpack.c.bf16 %v567_v35, %v566_v34 }
  0x9f   : > { %v2358_v40 = vunpack.i.h.bf16 %v2356_v38  ;;  %v2357_v41 = vunpack.i.l.bf16 %v2356_v38 }
  0xa0   : > { %v564_v42 = vsel %vm560_vm2, %v515_v10, %v2348_v36  ;;  %v563_v43 = vsel %vm560_vm2, %v514_v5, %v2347_v37  ;;  %2193 = vmatprep.mubr.msk.bf16.mxu0 %vm596_vm4, %v570_v39  ;;  %v2887_v10 = vld [vmem:[%s3511_s3 + $0x48] sm:$0xff]  }
  0xa1   : > { %v568_v44 = vsel %vm565_vm3, %v563_v43, %v2357_v41  ;;  %v569_v45 = vsel %vm565_vm3, %v564_v42, %v2358_v40  ;;  %881 = vmatpush2.bf16.msra.mxu1 %v2887_v10 }
  0xa2   : > { %v571_v46 = vpack.c.bf16 %v569_v45, %v568_v44  ;;  %882 = vmatprep.subr.bf16.mxu1 %v2616_v48 }
  0xa4   : > { %2194 = vmatmul.mubr.msk.bf16.vlgmr.msra.gmra.mxu0 %vm596_vm4, %v571_v46 }
  0xa5   : > { %883 = vmatpush2.bf16.msra.mxu1 %v2898_v15 }
  0xa6   : > { %1338 = vmatprep.subr.bf16.mxu1 %v2616_v48 }
 0x164   : > { %v2195_v57 = vpop.f32.mrf.mxu0 }
 0x165   : > { %v659_v59 = vmul.f32 %v2195_v57, %v2866_v56 }
 0x166   : > { %v637_v60 = vpop.f32.mrf.mxu0 }
 0x167   : > { %v668_v61 = vadd.f32 %v2871_v58, %v659_v59  ;;  %v657_v62 = vmul.f32 %v2866_v56, %v637_v60 }
 0x168   : > { %v2196_v63 = vpop.f32.mrf.mxu0 }
 0x169   : > { %v666_v3 = vadd.f32 %v2871_v58, %v657_v62  ;;  %v660_v4 = vmul.f32 %v2196_v63, %v2866_v56  ;;  %v2878_v6 = vmax.f32 %v668_v61, 0.0 }
 0x16a   : > { %v640_v5 = vpop.f32.mrf.mxu0 }
 0x16b   : > { %v669_v7 = vadd.f32 %v2871_v58, %v660_v4  ;;  %v658_v8 = vmul.f32 %v2866_v56, %v640_v5  ;;  %v2882_v9 = vmax.f32 %v666_v3, 0.0  ;;  %v740_v14 = vrot.slane %v2878_v6, 4 }
 0x16c   : > { %v700_v18 = vrot.slane %v2878_v6, 2  ;;  %v681_v19 = vrot.slane %v2878_v6, 1  ;;  %v720_v27 = vrot.slane %v2878_v6, 3 }
 0x16d   : > { %v2889_v11 = vmax.f32 %v669_v7, 0.0  ;;  %v667_v12 = vadd.f32 %v2871_v58, %v658_v8  ;;  %v737_v16 = vrot.slane %v2882_v9, 4  ;;  %v697_v17 = vrot.slane %v2882_v9, 2 }
 0x16e   : > { %v678_v24 = vrot.slane %v2882_v9, 1  ;;  %v717_v25 = vrot.slane %v2882_v9, 3 }
 0x16f   : > { %v671_v13 = vmax.f32 %v667_v12, 0.0  ;;  %v683_v23 = vrot.slane %v2889_v11, 1  ;;  %v722_v38 = vrot.slane %v2889_v11, 3  ;;  %v702_v41 = vrot.slane %v2889_v11, 2 }
 0x170   : > { %v742_v63 = vrot.slane %v2889_v11, 4 }
 0x171   : > { %v738_v20 = vrot.slane %v671_v13, 4  ;;  %v698_v21 = vrot.slane %v671_v13, 2  ;;  %v679_v22 = vrot.slane %v671_v13, 1  ;;  %v718_v26 = vrot.slane %v671_v13, 3 }
 0x172   : > { %v684_v37 = vsel %vm520_vm0, %v681_v19, %v683_v23  ;;  %v723_v44 = vsel %vm716_vm6, %v720_v27, %v722_v38  ;;  %v703_v45 = vsel %vm540_vm1, %v700_v18, %v702_v41 }
 0x173   : > { %v739_v28 = vsel %vm736_vm5, %v737_v16, %v738_v20  ;;  %v741_v29 = vsel %vm736_vm5, %v738_v20, %v740_v14  ;;  %v699_v30 = vsel %vm540_vm1, %v697_v17, %v698_v21  ;;  %v701_v31 = vsel %vm540_vm1, %v698_v21, %v700_v18 }
 0x174   : > { %v763_v32 = vpack.c.bf16 %v741_v29, %v739_v28  ;;  %v2364_v33 = vpack.i.bf16 %v701_v31, %v699_v30  ;;  %v680_v34 = vsel %vm520_vm0, %v678_v24, %v679_v22  ;;  %v682_v35 = vsel %vm520_vm0, %v679_v22, %v681_v19 }
 0x175   : > { %v2359_v36 = vpack.i.bf16 %v682_v35, %v680_v34  ;;  %v719_v39 = vsel %vm716_vm6, %v717_v25, %v718_v26  ;;  %v721_v40 = vsel %vm716_vm6, %v718_v26, %v720_v27  ;;  %v2374_v42 = vpack.i.bf16 %v683_v23, %v684_v37 }
 0x176   : > { %2085 = vmatprep.mubr.msk.bf16.mxu1 %vm565_vm3, %v763_v32  ;;  %2365 = vrot.lane.b32.xlu1 %v2364_v33, %s2617_s24  ;;  %v2369_v43 = vpack.i.bf16 %v721_v40, %v719_v39  ;;  %v2384_v46 = vpack.i.bf16 %v722_v38, %v723_v44  ;;  %v2379_v57 = vpack.i.bf16 %v702_v41, %v703_v45  ;;  %v3019_v41 = vld [vmem:[%s3478_s5 + $0x8] sm:$0xff]  }
 0x177   : > { %2360 = vrot.lane.b32.xlu0 %v2359_v36, %s2615_s23  ;;  %v743_v18 = vsel %vm736_vm5, %v740_v14, %v742_v63 }
 0x178   : > { %v765_v26 = vpack.c.bf16 %v742_v63, %v743_v18  ;;  %v3052_v18 = vld [vmem:[%s2776_s16 + $0x38] sm:$0xff] }
 0x17a   : > { %2375 = vrot.lane.b32.xlu1 %v2374_v42, %s2615_s23 }
 0x17b   : > { %2370 = vrot.lane.b32.xlu0 %v2369_v43, %s3493_s27 }
 0x17e   : > { %2385 = vrot.lane.b32.xlu1 %v2384_v46, %s3493_s27 }
 0x17f   : > { %2380 = vrot.lane.b32.xlu0 %v2379_v57, %s2617_s24 }
 0x1e8   : > { %v2366_v59 = vpop.permute.xlu1 %2365 }
 0x1e9   : > { %v2361_v60 = vpop.permute.xlu0 %2360  ;;  %v2368_v3 = vunpack.i.h.bf16 %v2366_v59  ;;  %v2367_v4 = vunpack.i.l.bf16 %v2366_v59 }
 0x1ea   : > { %v2363_v61 = vunpack.i.h.bf16 %v2361_v60  ;;  %v2362_v62 = vunpack.i.l.bf16 %v2361_v60  ;;  %v3031_v60 = vld [vmem:[%s2776_s16 + $0x20] sm:$0xff] }
 0x1ec   : > { %v749_v5 = vsel %vm565_vm3, %v671_v13, %v2363_v61  ;;  %v748_v7 = vsel %vm565_vm3, %v2882_v9, %v2362_v62  ;;  %v2376_v8 = vpop.permute.xlu1 %2375  ;;  %v3034_v61 = vld [vmem:[%s2776_s16 + $0x28] sm:$0xff]  ;;  %v3037_v62 = vld [vmem:[%s2776_s16 + $0x30] sm:$0xff]  ;;  %s3514_s16 = smov 16  }
 0x1ed   : > { %v2371_v12 = vpop.permute.xlu0 %2370  ;;  %v2378_v19 = vunpack.i.h.bf16 %v2376_v8  ;;  %v2377_v20 = vunpack.i.l.bf16 %v2376_v8  ;;  %v753_v21 = vsel %vm752_vm7, %v748_v7, %v2367_v4  ;;  %v754_v22 = vsel %vm752_vm7, %v749_v5, %v2368_v3  ;;  %v3042_v3 = vld [vmem:[%s3478_s5] sm:$0xff]  }
 0x1ee   : > { %v2373_v16 = vunpack.i.h.bf16 %v2371_v12  ;;  %v2372_v17 = vunpack.i.l.bf16 %v2371_v12  ;;  %v1129_v12 = vrot.slane %v3031_v60, 1 }
 0x1ef   : > { %v751_v14 = vsel %vm565_vm3, %v2889_v11, %v2378_v19  ;;  %v750_v31 = vsel %vm565_vm3, %v2878_v6, %v2377_v20 }
 0x1f0   : > { %v2386_v13 = vpop.permute.xlu1 %2385  ;;  %v758_v23 = vsel %vm757_vm8, %v753_v21, %v2372_v17  ;;  %v759_v9 = vsel %vm757_vm8, %v754_v22, %v2373_v16  ;;  %v1130_v16 = vrot.slane %v3034_v61, 1  ;;  %v1132_v17 = vrot.slane %v3037_v62, 1 }
 0x1f1   : > { %v2381_v24 = vpop.permute.xlu0 %2380  ;;  %v762_v25 = vpack.c.bf16 %v759_v9, %v758_v23  ;;  %v2388_v27 = vunpack.i.h.bf16 %v2386_v13  ;;  %v2387_v28 = vunpack.i.l.bf16 %v2386_v13 }
 0x1f2   : > { %v2383_v29 = vunpack.i.h.bf16 %v2381_v24  ;;  %v2382_v30 = vunpack.i.l.bf16 %v2381_v24 }
 0x1f3   : > { %885 = vmatmul.mubr.bf16.vlgmr.msra.gmra.mxu1 %v762_v25  ;;  %v1134_v25 = vrot.slane %v3052_v18, 1 }
 0x1f4   : > { %v756_v32 = vsel %vm752_vm7, %v751_v14, %v2383_v29  ;;  %v755_v33 = vsel %vm752_vm7, %v750_v31, %v2382_v30  ;;  %2086 = vmatprep.mubr.msk.bf16.mxu1 %vm565_vm3, %v765_v26  ;;  %1339 = vmatpush1.bf16.msra.mxu1 %v2809_v47  ;;  %v2974_v47 = vld [vmem:[%s3478_s5 + $0x28] sm:$0xff]   ;;  %v1131_v26 = vsel %vm520_vm0, %v1129_v12, %v1130_v16  ;;  %v1149_v29 = vrot.slane %v3034_v61, 2 }
 0x1f5   : > { %1340 = vmatprep.subr.bf16.mxu1 %v2616_v48  ;;  %v760_v34 = vsel %vm757_vm8, %v755_v33, %v2387_v28  ;;  %v761_v35 = vsel %vm757_vm8, %v756_v32, %v2388_v27  ;;  %2197 = vmatprep.subr.bf16.mxu0 %v2974_v47  ;;  %v1133_v27 = vsel %vm520_vm0, %v1130_v16, %v1132_v17  ;;  %v1148_v28 = vrot.slane %v3031_v60, 2 }
 0x1f6   : > { %v764_v11 = vpack.c.bf16 %v761_v35, %v760_v34  ;;  %2198 = vmatpush3.bf16.msra.mxu0 %v2974_v47  ;;  %v1151_v32 = vrot.slane %v3037_v62, 2  ;;  %v1135_v34 = vsel %vm520_vm0, %v1132_v17, %v1134_v25  ;;  %v1153_v35 = vrot.slane %v3052_v18, 2 }
 0x1f8   : > { %1341 = vmatpush1.bf16.msra.mxu1 %v2816_v49  ;;  %v2979_v49 = vld [vmem:[%s3478_s5 + $0x20] sm:$0xff]  }
 0x1f9   : > { %1342 = vmatprep.subr.bf16.mxu1 %v2616_v48  ;;  %2199 = vmatprep.subr.bf16.mxu0 %v2979_v49 }
 0x1fa   : > { %2200 = vmatpush3.bf16.msra.mxu0 %v2979_v49 }
 0x1fb   : > { %893 = vmatmul.mubr.bf16.gmra.mxu1 %v764_v11  ;;  %v2399_v11 = vpack.i.bf16 %v1133_v27, %v1131_v26 }
 0x1fc   : > { %1343 = vmatpush1.bf16.msra.mxu1 %v2823_v50  ;;  %v2994_v50 = vld [vmem:[%s3478_s5 + $0x10] sm:$0xff]  }
 0x1fd   : > { %1344 = vmatprep.subr.bf16.mxu1 %v2616_v48 }
 0x200   : > { %1345 = vmatpush1.bf16.msra.mxu1 %v2830_v51 }
 0x201   : > { %1346 = vmatprep.subr.bf16.mxu1 %v2616_v48 }
 0x204   : > { %1347 = vmatpush1.bf16.msra.mxu1 %v2837_v52  ;;  %v3002_v52 = vld [vmem:[%s3513_s4] ss:$0 sm:$0xff] }
 0x205   : > { %1348 = vmatprep.subr.bf16.mxu1 %v2616_v48 }
 0x208   : > { %1349 = vmatpush1.bf16.msra.mxu1 %v2844_v53 }
 0x209   : > { %1350 = vmatprep.subr.bf16.mxu1 %v2616_v48 }
 0x20c   : > { %1351 = vmatpush1.bf16.msra.mxu1 %v2851_v54 }
 0x20d   : > { %1352 = vmatprep.subr.bf16.mxu1 %v2616_v48 }
 0x210   : > { %1353 = vmatpush1.bf16.msra.mxu1 %v2858_v55  ;;  %v3008_v55 = vld [vmem:[%s3513_s4 + $0x1] ss:$0 sm:$0xff] }
 0x211   : > { %1366 = vmatprep.subr.bf16.mxu1 %v2616_v48 }
 0x214   : > { %1367 = vmatpush2.bf16.msra.mxu1 %v2887_v10 }
 0x215   : > { %1368 = vmatprep.subr.bf16.mxu1 %v2616_v48  ;;  %v2987_v48 = vld [vmem:[%s3478_s5 + $0x18] sm:$0xff]  }
 0x216   : > { %2201 = vmatprep.subr.bf16.mxu0 %v2987_v48 }
 0x217   : > { %2202 = vmatpush3.bf16.msra.mxu0 %v2987_v48 }
 0x218   : > { %1369 = vmatpush2.bf16.msra.mxu1 %v2898_v15  ;;  %2203 = vmatprep.subr.bf16.mxu0 %v2994_v50 }
 0x21b   : > { %2204 = vmatpush3.bf16.msra.mxu0 %v2994_v50 }
 0x21c   : > { %2205 = vmatprep.subr.bf16.mxu0 %v3019_v41 }
 0x21f   : > { %2206 = vmatpush3.bf16.msra.mxu0 %v3019_v41 }
 0x220   : > { %2207 = vmatprep.subr.bf16.mxu0 %v3042_v3 }
 0x223   : > { %2208 = vmatpush3.bf16.msra.mxu0 %v3042_v3 }
 0x224   : > { %2213 = vmatprep.subr.bf16.mxu0 %v2758_v0 }
 0x2b3   : > { %v886_v51 = vpop.f32.mrf.mxu1 }
 0x2b4   : > { %v906_v54 = vmul.f32 %v3002_v52, %v886_v51 }
 0x2b5   : > { %v888_v53 = vpop.f32.mrf.mxu1 }
 0x2b6   : > { %v915_v36 = vadd.f32 %v3008_v55, %v906_v54  ;;  %v1150_v53 = vsel %vm540_vm1, %v1148_v28, %v1149_v29  ;;  %v1152_v54 = vsel %vm540_vm1, %v1149_v29, %v1151_v32 }
 0x2b7   : > { %v889_v6 = vpop.f32.mrf.mxu1 }
 0x2b8   : > { %v907_v10 = vmul.f32 %v3002_v52, %v889_v6  ;;  %v3021_v43 = vmax.f32 %v915_v36, 0.0  ;;  %v2404_v6 = vpack.i.bf16 %v1134_v25, %v1135_v34 }
 0x2b9   : > { %v891_v15 = vpop.f32.mrf.mxu1 }
 0x2ba   : > { %v916_v37 = vadd.f32 %v3008_v55, %v907_v10  ;;  %v927_v4 = vrot.slane %v3021_v43, 1  ;;  %v943_v23 = vrot.slane %v3021_v43, 2  ;;  %v1154_v10 = vsel %vm540_vm1, %v1151_v32, %v1153_v35 }
 0x2bb   : > { %v894_v38 = vpop.f32.mrf.mxu1  ;;  %v2409_v15 = vpack.i.bf16 %v1152_v54, %v1150_v53  ;;  %v2414_v36 = vpack.i.bf16 %v1153_v35, %v1154_v10 }
 0x2bc   : > { %v3013_v39 = vmax.f32 %v916_v37, 0.0  ;;  %v908_v40 = vmul.f32 %v3002_v52, %v894_v38 }
 0x2bd   : > { %v896_v42 = vpop.f32.mrf.mxu1 }
 0x2be   : > { %v917_v44 = vadd.f32 %v3008_v55, %v908_v40  ;;  %v928_v46 = vrot.slane %v3013_v39, 1  ;;  %v944_v19 = vrot.slane %v3013_v39, 2 }
 0x2bf   : > { %v897_v45 = vpop.f32.mrf.mxu1 }
 0x2c0   : > { %v3027_v57 = vmax.f32 %v917_v44, 0.0  ;;  %v909_v59 = vmul.f32 %v3002_v52, %v897_v45  ;;  %v929_v21 = vsel %vm520_vm0, %v927_v4, %v928_v46  ;;  %v945_v31 = vsel %vm540_vm1, %v943_v23, %v944_v19 }
 0x2c1   : > { %v899_v63 = vpop.f32.mrf.mxu1 }
 0x2c2   : > { %v930_v5 = vrot.slane %v3027_v57, 1  ;;  %v946_v7 = vrot.slane %v3027_v57, 2  ;;  %v918_v8 = vadd.f32 %v3008_v55, %v909_v59 }
 0x2c4   : > { %v922_v20 = vmax.f32 %v918_v8, 0.0  ;;  %v931_v22 = vsel %vm520_vm0, %v928_v46, %v930_v5  ;;  %v947_v24 = vsel %vm540_vm1, %v944_v19, %v946_v7 }
 0x2c5   : > { %v2389_v13 = vpack.i.bf16 %v931_v22, %v929_v21  ;;  %v2394_v33 = vpack.i.bf16 %v947_v24, %v945_v31 }
 0x2c6   : > { %v932_v9 = vrot.slane %v922_v20, 1  ;;  %v948_v30 = vrot.slane %v922_v20, 2 }
 0x2c7   : > { %2390 = vrot.lane.b32.xlu0 %v2389_v13, %s2615_s23 }
 0x2c8   : > { %v933_v14 = vsel %vm520_vm0, %v930_v5, %v932_v9  ;;  %v949_v51 = vsel %vm540_vm1, %v946_v7, %v948_v30 }
 0x2c9   : > { %938 = vrot.lane.b32.xlu1 %v933_v14, %s2615_s23 }
 0x2cb   : > { %2395 = vrot.lane.b32.xlu0 %v2394_v33, %s2617_s24 }
 0x2cd   : > { %954 = vrot.lane.b32.xlu1 %v949_v51, %s2617_s24 }
 0x2cf   : > { %2400 = vrot.lane.b32.xlu0 %v2399_v11, %s3514_s16 }
 0x2d1   : > { %2405 = vrot.lane.b32.xlu1 %v2404_v6, %s3514_s16  ;;  %s3381_s16 = sshll.u32 %s2725_s22, 5 }
 0x2d2   : > { %s3393_s1 = scalar_lea.hbm %s3486_s13, %s3381_s16 }
 0x2d3   : > { %2410 = vrot.lane.b32.xlu0 %v2409_v15, %s2615_s23 }
 0x2d5   : > { %2415 = vrot.lane.b32.xlu1 %v2414_v36, %s2615_s23 }
 0x339   : > { %v2391_v37 = vpop.permute.xlu0 %2390 }
 0x33a   : > { %v2393_v38 = vunpack.i.h.bf16 %v2391_v37  ;;  %v2392_v40 = vunpack.i.l.bf16 %v2391_v37 }
 0x33b   : > { %v939_v42 = vpop.permute.xlu1 %938 }
 0x33c   : > { %v960_v59 = vsel %vm565_vm3, %v3013_v39, %v2393_v38  ;;  %v959_v63 = vsel %vm565_vm3, %v3021_v43, %v2392_v40  ;;  %v961_v4 = vsel %vm565_vm3, %v3027_v57, %v939_v42 }
 0x33d   : > { %v2396_v44 = vpop.permute.xlu0 %2395 }
 0x33e   : > { %v2398_v45 = vunpack.i.h.bf16 %v2396_v44  ;;  %v2397_v46 = vunpack.i.l.bf16 %v2396_v44 }
 0x33f   : > { %v955_v5 = vpop.permute.xlu1 %954 }
 0x340   : > { %v962_v7 = vsel %vm752_vm7, %v959_v63, %v2397_v46  ;;  %v963_v8 = vsel %vm752_vm7, %v960_v59, %v2398_v45  ;;  %v964_v12 = vsel %vm752_vm7, %v961_v4, %v955_v5 }
 0x341   : > { %v965_v16 = vpack.c.bf16 %v963_v8, %v962_v7  ;;  %v966_v17 = vpack.c.bf16 %v964_v12, %v964_v12  ;;  %v2401_v19 = vpop.permute.xlu0 %2400 }
 0x342   : > { %v2403_v20 = vunpack.i.h.bf16 %v2401_v19  ;;  %v2402_v21 = vunpack.i.l.bf16 %v2401_v19 }
 0x343   : > { %2209 = vmatprep.mubr.msk.bf16.mxu0 %vm757_vm8, %v965_v16  ;;  %v2406_v39 = vpop.permute.xlu1 %2405 }
 0x344   : > { %v2408_v22 = vunpack.i.h.bf16 %v2406_v39  ;;  %v2407_v43 = vunpack.i.l.bf16 %v2406_v39  ;;  %2210 = vmatmul.mubr.msk.bf16.vlgmr.msra.gmra.mxu0 %vm757_vm8, %v966_v17  ;;  %v1168_v57 = vsel %vm560_vm2, %v3034_v61, %v2403_v20  ;;  %v1167_v13 = vsel %vm560_vm2, %v3031_v60, %v2402_v21 }
 0x345   : > { %2214 = vmatpush3.bf16.msra.mxu0 %v2758_v0  ;;  %v2411_v23 = vpop.permute.xlu0 %2410 }
 0x346   : > { %v2413_v9 = vunpack.i.h.bf16 %v2411_v23  ;;  %v2412_v24 = vunpack.i.l.bf16 %v2411_v23  ;;  %2215 = vmatprep.subr.bf16.mxu0 %v2764_v1  ;;  %v1170_v25 = vsel %vm560_vm2, %v3052_v18, %v2408_v22  ;;  %v1169_v26 = vsel %vm560_vm2, %v3037_v62, %v2407_v43 }
 0x347   : > { %v2416_v27 = vpop.permute.xlu1 %2415 }
 0x348   : > { %v1171_v28 = vsel %vm565_vm3, %v1167_v13, %v2412_v24  ;;  %v1172_v61 = vsel %vm565_vm3, %v1168_v57, %v2413_v9  ;;  %v2418_v29 = vunpack.i.h.bf16 %v2416_v27  ;;  %v2417_v60 = vunpack.i.l.bf16 %v2416_v27 }
 0x349   : > { %v1175_v30 = vpack.c.bf16 %v1172_v61, %v1171_v28  ;;  %2216 = vmatpush3.bf16.msra.mxu0 %v2764_v1 }
 0x34a   : > { %2217 = vmatprep.subr.bf16.mxu0 %v2771_v2  ;;  %v1173_v0 = vsel %vm565_vm3, %v1169_v26, %v2417_v60  ;;  %v1174_v14 = vsel %vm565_vm3, %v1170_v25, %v2418_v29 }
 0x34b   : > { %2219 = vmatprep.mubr.msk.bf16.mxu0 %vm596_vm4, %v1175_v30  ;;  %v1176_v62 = vpack.c.bf16 %v1174_v14, %v1173_v0 }
 0x34d   : > { %2218 = vmatpush3.bf16.msra.mxu0 %v2771_v2  ;;  %v3129_v2 = vld [vmem:[%s3479_s6] ss:$0 sm:$0xff] }
 0x34e   : > { %2223 = vmatprep.subr.bf16.mxu0 %v2974_v47 }
 0x350   : > { %2220 = vmatmul.mubr.msk.bf16.vlgmr.msra.gmra.mxu0 %vm596_vm4, %v1176_v62 }
 0x351   : > { %2224 = vmatpush3.bf16.msra.mxu0 %v2974_v47 }
 0x352   : > { %2225 = vmatprep.subr.bf16.mxu0 %v2979_v49 }
 0x355   : > { %2226 = vmatpush3.bf16.msra.mxu0 %v2979_v49 }
 0x356   : > { %2227 = vmatprep.subr.bf16.mxu0 %v2987_v48 }
 0x359   : > { %2228 = vmatpush3.bf16.msra.mxu0 %v2987_v48 }
 0x35a   : > { %2229 = vmatprep.subr.bf16.mxu0 %v2994_v50 }
 0x35d   : > { %2230 = vmatpush3.bf16.msra.mxu0 %v2994_v50  ;;  %v3136_v50 = vld [vmem:[%s3479_s6 + $0x1] ss:$0 sm:$0xff] }
 0x35e   : > { %2231 = vmatprep.subr.bf16.mxu0 %v3019_v41 }
 0x361   : > { %2232 = vmatpush3.bf16.msra.mxu0 %v3019_v41 }
 0x362   : > { %2233 = vmatprep.subr.bf16.mxu0 %v3042_v3 }
 0x365   : > { %2234 = vmatpush3.bf16.msra.mxu0 %v3042_v3 }
 0x404   : > { %v2211_v1 = vpop.f32.mrf.mxu0 }
 0x405   : > { %v1076_v49 = vmul.f32 %v2211_v1, %v3129_v2 }
 0x406   : > { %v1055_v47 = vpop.f32.mrf.mxu0 }
 0x407   : > { %v1074_v48 = vmul.f32 %v3129_v2, %v1055_v47  ;;  %v3142_v31 = vadd.f32 %v3136_v50, %v1076_v49 }
 0x408   : > { %v2212_v41 = vpop.f32.mrf.mxu0 }
 0x409   : > { %v3139_v18 = vadd.f32 %v3136_v50, %v1074_v48  ;;  %v1087_v35 = vmax.f32 %v3142_v31, 0.0 }
 0x40a   : > { %v1058_v3 = vpop.f32.mrf.mxu0 }
 0x40b   : > { %v1075_v32 = vmul.f32 %v3129_v2, %v1058_v3  ;;  %v1085_v33 = vmax.f32 %v3139_v18, 0.0  ;;  %v1091_v36 = vsel %vm752_vm7, %v1087_v35, 0.0 }
 0x40d   : > { %v1083_v34 = vadd.f32 %v3136_v50, %v1075_v32  ;;  %v1088_v53 = vsel %vm752_vm7, %v1085_v33, 0.0 }
 0x40f   : > { %v1086_v11 = vmax.f32 %v1083_v34, 0.0 }
 0x410   : > { %v2221_v51 = vpop.f32.mrf.mxu0 }
 0x411   : > { %v1089_v54 = vsel %vm752_vm7, %v1086_v11, 0.0  ;;  %v1234_v6 = vmul.f32 %v2221_v51, %v2866_v56 }
 0x412   : > { %v1090_v10 = vadd.f32 %v1089_v54, %v1088_v53  ;;  %v1217_v15 = vpop.f32.mrf.mxu0 }
 0x413   : > { %v1238_v37 = vadd.f32 %v2871_v58, %v1234_v6  ;;  %v1232_v38 = vmul.f32 %v2866_v56, %v1217_v15 }
 0x414   : > { %v1092_v40 = vadd.f32 %v1091_v36, %v1090_v10  ;;  %v2222_v42 = vpop.f32.mrf.mxu0 }
 0x415   : > { %v1236_v44 = vadd.f32 %v2871_v58, %v1232_v38  ;;  %v1235_v45 = vmul.f32 %v2222_v42, %v2866_v56  ;;  %v3156_v63 = vmax.f32 %v1238_v37, 0.0 }
 0x416   : > { %v1093_v46 = vrot.slane %v1092_v40, 4  ;;  %v1220_v59 = vpop.f32.mrf.mxu0 }
 0x417   : > { %v1239_v4 = vadd.f32 %v2871_v58, %v1235_v45  ;;  %v1233_v5 = vmul.f32 %v2866_v56, %v1220_v59  ;;  %v3160_v8 = vmax.f32 %v1236_v44, 0.0  ;;  %v1308_v20 = vrot.slane %v3156_v63, 4 }
 0x418   : > { %v1094_v7 = vadd.f32 %v1093_v46, %v1092_v40  ;;  %v1270_v21 = vrot.slane %v3156_v63, 2  ;;  %v1251_v56 = vrot.slane %v3156_v63, 1  ;;  %v1289_v26 = vrot.slane %v3156_v63, 3 }
 0x419   : > { %v3162_v12 = vmax.f32 %v1239_v4, 0.0  ;;  %v1237_v16 = vadd.f32 %v2871_v58, %v1233_v5  ;;  %v1305_v22 = vrot.slane %v3160_v8, 4  ;;  %v1267_v43 = vrot.slane %v3160_v8, 2 }
 0x41a   : > { %v1095_v17 = vrot.slane %v1094_v7, 2  ;;  %v1248_v24 = vrot.slane %v3160_v8, 1  ;;  %v1286_v47 = vrot.slane %v3160_v8, 3 }
 0x41b   : > { %v3165_v19 = vmax.f32 %v1237_v16, 0.0  ;;  %v1253_v23 = vrot.slane %v3162_v12, 1  ;;  %v1291_v49 = vrot.slane %v3162_v12, 3  ;;  %v1272_v31 = vrot.slane %v3162_v12, 2 }
 0x41c   : > { %v1096_v39 = vadd.f32 %v1095_v17, %v1094_v7  ;;  %v1310_v5 = vrot.slane %v3162_v12, 4 }
 0x41d   : > { %v1306_v57 = vrot.slane %v3165_v19, 4  ;;  %v1268_v13 = vrot.slane %v3165_v19, 2  ;;  %v1249_v58 = vrot.slane %v3165_v19, 1  ;;  %v1287_v25 = vrot.slane %v3165_v19, 3 }
 0x41e   : > { %v1097_v9 = vrot.slane %v1096_v39, 1  ;;  %v1254_v1 = vsel %vm520_vm0, %v1251_v56, %v1253_v23  ;;  %v1292_v54 = vsel %vm716_vm6, %v1289_v26, %v1291_v49  ;;  %v1273_v37 = vsel %vm540_vm1, %v1270_v21, %v1272_v31 }
 0x41f   : > { %v1307_v27 = vsel %vm736_vm5, %v1305_v22, %v1306_v57  ;;  %v1309_v28 = vsel %vm736_vm5, %v1306_v57, %v1308_v20  ;;  %v1269_v61 = vsel %vm540_vm1, %v1267_v43, %v1268_v13  ;;  %v1271_v29 = vsel %vm540_vm1, %v1268_v13, %v1270_v21 }
 0x420   : > { %v1098_v60 = vadd.f32 %v1097_v9, %v1096_v39  ;;  %v1329_v30 = vpack.c.bf16 %v1309_v28, %v1307_v27  ;;  %v2424_v0 = vpack.i.bf16 %v1271_v29, %v1269_v61  ;;  %v1250_v14 = vsel %vm520_vm0, %v1248_v24, %v1249_v58 }
 0x421   : > { %v1252_v62 = vsel %vm520_vm0, %v1249_v58, %v1251_v56  ;;  %v1288_v18 = vsel %vm716_vm6, %v1286_v47, %v1287_v25  ;;  %v1290_v3 = vsel %vm716_vm6, %v1287_v25, %v1289_v26  ;;  %v2434_v53 = vpack.i.bf16 %v1253_v23, %v1254_v1 }
 0x422   : > { %v3190_v48 = vmul.f32 0.041666668, %v1098_v60  ;;  %2105 = vmatprep.mubr.msk.bf16.mxu1 %vm565_vm3, %v1329_v30  ;;  %2425 = vrot.lane.b32.xlu1 %v2424_v0, %s2617_s24  ;;  %v2419_v41 = vpack.i.bf16 %v1252_v62, %v1250_v14  ;;  %v2429_v36 = vpack.i.bf16 %v1290_v3, %v1288_v18  ;;  %v2439_v42 = vpack.i.bf16 %v1272_v31, %v1273_v37 }
 0x423   : > { %v1311_v57 = vsel %vm736_vm5, %v1308_v20, %v1310_v5 }
 0x424   : > { %v1101_v32 = vsub.f32 %v1085_v33, %v3190_v48  ;;  %v1102_v34 = vsub.f32 %v1086_v11, %v3190_v48  ;;  %v1103_v51 = vsub.f32 %v1087_v35, %v3190_v48  ;;  %2420 = vrot.lane.b32.xlu0 %v2419_v41, %s2615_s23  ;;  %v2444_v35 = vpack.i.bf16 %v1291_v49, %v1292_v54 }
 0x425   : > { %v1331_v27 = vpack.c.bf16 %v1310_v5, %v1311_v57 }
 0x426   : > { %v1104_v6 = vmul.f32 %v1101_v32, %v1101_v32  ;;  %v1105_v10 = vmul.f32 %v1102_v34, %v1102_v34  ;;  %v1106_v15 = vmul.f32 %v1103_v51, %v1103_v51  ;;  %2435 = vrot.lane.b32.xlu1 %v2434_v53, %s2615_s23 }
 0x428   : > { %v1107_v38 = vsel %vm752_vm7, %v1104_v6, 0.0  ;;  %v1108_v33 = vsel %vm752_vm7, %v1105_v10, 0.0  ;;  %2430 = vrot.lane.b32.xlu0 %v2429_v36, %s3515_s26  ;;  %v1110_v40 = vsel %vm752_vm7, %v1106_v15, 0.0 }
 0x429   : > { %v1109_v11 = vadd.f32 %v1108_v33, %v1107_v38 }
 0x42a   : > { %2445 = vrot.lane.b32.xlu1 %v2444_v35, %s3515_s26 }
 0x42b   : > { %v3209_v44 = vadd.f32 %v1110_v40, %v1109_v11 }
 0x42c   : > { %2440 = vrot.lane.b32.xlu0 %v2439_v42, %s2617_s24 }
 0x494   : > { %v2426_v45 = vpop.permute.xlu1 %2425 }
 0x495   : > { %v2428_v7 = vunpack.i.h.bf16 %v2426_v45  ;;  %v2427_v16 = vunpack.i.l.bf16 %v2426_v45 }
 0x496   : > { %v2421_v46 = vpop.permute.xlu0 %2420 }
 0x497   : > { %v2423_v59 = vunpack.i.h.bf16 %v2421_v46  ;;  %v2422_v4 = vunpack.i.l.bf16 %v2421_v46 }
 0x498   : > { %v2436_v17 = vpop.permute.xlu1 %2435 }
 0x499   : > { %v1317_v21 = vsel %vm565_vm3, %v3165_v19, %v2423_v59  ;;  %v1316_v39 = vsel %vm565_vm3, %v3160_v8, %v2422_v4  ;;  %v2438_v13 = vunpack.i.h.bf16 %v2436_v17  ;;  %v2437_v58 = vunpack.i.l.bf16 %v2436_v17 }
 0x49a   : > { %v2431_v22 = vpop.permute.xlu0 %2430  ;;  %v1320_v23 = vsel %vm752_vm7, %v1316_v39, %v2427_v16  ;;  %v1321_v9 = vsel %vm752_vm7, %v1317_v21, %v2428_v7 }
 0x49b   : > { %v2433_v43 = vunpack.i.h.bf16 %v2431_v22  ;;  %v2432_v56 = vunpack.i.l.bf16 %v2431_v22  ;;  %v1319_v20 = vsel %vm565_vm3, %v3162_v12, %v2438_v13  ;;  %v1318_v30 = vsel %vm565_vm3, %v3156_v63, %v2437_v58 }
 0x49c   : > { %v2446_v24 = vpop.permute.xlu1 %2445 }
 0x49d   : > { %v1324_v25 = vsel %vm757_vm8, %v1320_v23, %v2432_v56  ;;  %v1325_v19 = vsel %vm757_vm8, %v1321_v9, %v2433_v43  ;;  %v2448_v28 = vunpack.i.h.bf16 %v2446_v24  ;;  %v2447_v61 = vunpack.i.l.bf16 %v2446_v24 }
 0x49e   : > { %v1328_v26 = vpack.c.bf16 %v1325_v19, %v1324_v25  ;;  %v2441_v8 = vpop.permute.xlu0 %2440 }
 0x49f   : > { %v2443_v29 = vunpack.i.h.bf16 %v2441_v8  ;;  %v2442_v60 = vunpack.i.l.bf16 %v2441_v8 }
 0x4a0   : > { %1371 = vmatmul.mubr.bf16.vlgmr.msra.gmra.mxu1 %v1328_v26 }
 0x4a1   : > { %v1323_v0 = vsel %vm752_vm7, %v1319_v20, %v2443_v29  ;;  %v1322_v14 = vsel %vm752_vm7, %v1318_v30, %v2442_v60  ;;  %2106 = vmatprep.mubr.msk.bf16.mxu1 %vm565_vm3, %v1331_v27  ;;  %v2478_v60 = vld [vmem:[%s3480_s7 + $0x18] sm:$0xff]   ;;  %v2619_v20 = vmov 0.0   ;;  %v2479_v30 = vld [vmem:[%s3480_s7 + $0x10] sm:$0xff]  }
 0x4a2   : > { %v1326_v62 = vsel %vm757_vm8, %v1322_v14, %v2447_v61  ;;  %v1327_v1 = vsel %vm757_vm8, %v1323_v0, %v2448_v28  ;;  %2251 = vmatprep.subr.bf16.mxu1 %v2619_v20  ;;  %2239 = vmatprep.subr.bf16.mxu0 %v2619_v20  ;;  %v2480_v0 = vld [vmem:[%s3480_s7 + $0x8] sm:$0xff]   ;;  %v2481_v14 = vld [vmem:[%s3480_s7] sm:$0xff]  }
 0x4a3   : > { %v1330_v47 = vpack.c.bf16 %v1327_v1, %v1326_v62  ;;  %2252 = vmatpush3.bf16.msra.mxu1 %v2478_v60  ;;  %v2482_v62 = vld [vmem:[%s3480_s7 + $0x38] sm:$0xff]   ;;  %v2483_v1 = vld [vmem:[%s3480_s7 + $0x30] sm:$0xff]  }
 0x4a4   : > { %2253 = vmatprep.subr.bf16.mxu1 %v2619_v20  ;;  %v2487_v60 = vld [vmem:[%s3482_s9 + $0x10] sm:$0xff]  }
 0x4a7   : > { %2254 = vmatpush3.bf16.msra.mxu1 %v2479_v30  ;;  %v2488_v30 = vld [vmem:[%s3482_s9 + $0x8] sm:$0xff]  }
 0x4a8   : > { %1379 = vmatmul.mubr.bf16.gmra.mxu1 %v1330_v47  ;;  %2255 = vmatprep.subr.bf16.mxu1 %v2619_v20  ;;  %v2484_v47 = vld [vmem:[%s3480_s7 + $0x28] sm:$0xff]  }
 0x4a9   : > { %2259 = vmatprep.mubr.msk.bf16.mxu1 %vm2620_vm9, %v2619_v20 }
 0x4ab   : > { %2256 = vmatpush3.bf16.msra.mxu1 %v2480_v0  ;;  %v2489_v0 = vld [vmem:[%s3482_s9] sm:$0xff]  }
 0x4ac   : > { %2257 = vmatprep.subr.bf16.mxu1 %v2619_v20 }
 0x4af   : > { %2258 = vmatpush3.bf16.msra.mxu1 %v2481_v14 }
 0x4b0   : > { %2275 = vmatprep.subr.bf16.mxu1 %v2619_v20 }
 0x560   : > { %v1372_v49 = vpop.f32.mrf.mxu1 }
 0x561   : > { %v1387_v12 = vmul.f32 %v3002_v52, %v1372_v49  ;;  %v2485_v49 = vld [vmem:[%s3480_s7 + $0x20] sm:$0xff]  }
 0x562   : > { %v1374_v41 = vpop.f32.mrf.mxu1 }
 0x563   : > { %v1391_v31 = vadd.f32 %v3008_v55, %v1387_v12 }
 0x564   : > { %v1375_v18 = vpop.f32.mrf.mxu1 }
 0x565   : > { %v1388_v63 = vmul.f32 %v3002_v52, %v1375_v18  ;;  %v1395_v6 = vmax.f32 %v1391_v31, 0.0 }
 0x566   : > { %v1377_v3 = vpop.f32.mrf.mxu1 }
 0x567   : > { %v1392_v32 = vadd.f32 %v3008_v55, %v1388_v63  ;;  %v1403_v35 = vrot.slane %v1395_v6, 1  ;;  %v1419_v7 = vrot.slane %v1395_v6, 2 }
 0x568   : > { %v1380_v34 = vpop.f32.mrf.mxu1 }
 0x569   : > { %v1396_v51 = vmax.f32 %v1392_v32, 0.0  ;;  %v1389_v53 = vmul.f32 %v3002_v52, %v1380_v34 }
 0x56a   : > { %v1382_v54 = vpop.f32.mrf.mxu1 }
 0x56b   : > { %v1393_v10 = vadd.f32 %v3008_v55, %v1389_v53  ;;  %v1404_v36 = vrot.slane %v1396_v51, 1  ;;  %v1420_v45 = vrot.slane %v1396_v51, 2 }
 0x56c   : > { %v1383_v15 = vpop.f32.mrf.mxu1 }
 0x56d   : > { %v1397_v37 = vmax.f32 %v1393_v10, 0.0  ;;  %v1390_v38 = vmul.f32 %v3002_v52, %v1383_v15  ;;  %v1405_v59 = vsel %vm520_vm0, %v1403_v35, %v1404_v36  ;;  %v1421_v39 = vsel %vm540_vm1, %v1419_v7, %v1420_v45 }
 0x56e   : > { %v1385_v33 = vpop.f32.mrf.mxu1 }
 0x56f   : > { %v1406_v11 = vrot.slane %v1397_v37, 1  ;;  %v1422_v40 = vrot.slane %v1397_v37, 2  ;;  %v1394_v42 = vadd.f32 %v3008_v55, %v1390_v38 }
 0x571   : > { %v1398_v46 = vmax.f32 %v1394_v42, 0.0  ;;  %v1407_v4 = vsel %vm520_vm0, %v1404_v36, %v1406_v11  ;;  %v1423_v17 = vsel %vm540_vm1, %v1420_v45, %v1422_v40 }
 0x572   : > { %v2449_v5 = vpack.i.bf16 %v1407_v4, %v1405_v59  ;;  %v2454_v55 = vpack.i.bf16 %v1423_v17, %v1421_v39 }
 0x573   : > { %v1408_v16 = vrot.slane %v1398_v46, 1  ;;  %v1424_v52 = vrot.slane %v1398_v46, 2 }
 0x574   : > { %2450 = vrot.lane.b32.xlu0 %v2449_v5, %s2615_s23 }
 0x575   : > { %v1409_v21 = vsel %vm520_vm0, %v1406_v11, %v1408_v16  ;;  %v1425_v22 = vsel %vm540_vm1, %v1422_v40, %v1424_v52 }
 0x576   : > { %1414 = vrot.lane.b32.xlu1 %v1409_v21, %s2615_s23  ;;  %s3387_s23 = scalar_lea.hbm %s3487_s14, %s3381_s16 }
 0x578   : > { %2455 = vrot.lane.b32.xlu0 %v2454_v55, %s2617_s24 }
 0x57a   : > { %1430 = vrot.lane.b32.xlu1 %v1425_v22, %s2617_s24  ;;  %s498_s24 = scalar_lea.vmem [#allocation4], %s3338_s25 }
 0x57b   : > { %s1926_s20 = sshll.u32 %s498_s24, 4  ;;  %s1927_s20 = int_to_ptr.vmem [resolvable:$true] %s1926_s20 }
 0x57c   : > { %s2496_s3 = scalar_lea.vmem %s1927_s20, 32 }
 0x57d   : > { %p2497_p11 = scmp.ne.s32.totalorder %s1927_s20, %s2496_s3 }
 0x57f   : > { %p2498_p12 = pnand %p2497_p11, %p2744_p5 }
 0x581   : > { %p2499_p13 = pneg %p2498_p12 }
 0x5e6   : > { %v2451_v43 = vpop.permute.xlu0 %2450 }
 0x5e7   : > { %v2453_v56 = vunpack.i.h.bf16 %v2451_v43  ;;  %v2452_v57 = vunpack.i.l.bf16 %v2451_v43 }
 0x5e8   : > { %v1415_v13 = vpop.permute.xlu1 %1414 }
 0x5e9   : > { %v1436_v24 = vsel %vm565_vm3, %v1396_v51, %v2453_v56  ;;  %v1435_v25 = vsel %vm565_vm3, %v1395_v6, %v2452_v57  ;;  %v1437_v19 = vsel %vm565_vm3, %v1397_v37, %v1415_v13 }
 0x5ea   : > { %v2456_v58 = vpop.permute.xlu0 %2455 }
 0x5eb   : > { %v2458_v23 = vunpack.i.h.bf16 %v2456_v58  ;;  %v2457_v9 = vunpack.i.l.bf16 %v2456_v58 }
 0x5ec   : > { %v1431_v26 = vpop.permute.xlu1 %1430 }
 0x5ed   : > { %v1438_v8 = vsel %vm752_vm7, %v1435_v25, %v2457_v9  ;;  %v1439_v27 = vsel %vm752_vm7, %v1436_v24, %v2458_v23  ;;  %v1440_v28 = vsel %vm752_vm7, %v1437_v19, %v1431_v26 }
 0x5ee   : > { %v1441_v61 = vpack.c.bf16 %v1439_v27, %v1438_v8  ;;  %v1442_v29 = vpack.c.bf16 %v1440_v28, %v1440_v28 }
 0x5f0   : > { %2235 = vmatprep.mubr.msk.bf16.mxu0 %vm757_vm8, %v1441_v61 }
 0x5f1   : > { %2236 = vmatmul.mubr.msk.bf16.vlgmr.msra.gmra.mxu0 %vm757_vm8, %v1442_v29  ;;  %v2486_v29 = vld [vmem:[%s3482_s9 + $0x18] sm:$0xff]  }
 0x5f2   : > { %2247 = vmatprep.mubr.msk.bf16.mxu0 %vm2620_vm9, %v2619_v20  ;;  %2240 = vmatpush3.bf16.msra.mxu0 %v2482_v62 }
 0x5f3   : > { %2241 = vmatprep.subr.bf16.mxu0 %v2619_v20 }
 0x5f6   : > { %2242 = vmatpush3.bf16.msra.mxu0 %v2483_v1 }
 0x5f7   : > { %2243 = vmatprep.subr.bf16.mxu0 %v2619_v20 }
 0x5fa   : > { %2244 = vmatpush3.bf16.msra.mxu0 %v2484_v47 }
 0x5fb   : > { %2245 = vmatprep.subr.bf16.mxu0 %v2619_v20 }
 0x5fe   : > { %2246 = vmatpush3.bf16.msra.mxu0 %v2485_v49 }
 0x5ff   : > { %2263 = vmatprep.subr.bf16.mxu0 %v2619_v20 }
 0x6b1   : > { %v2237_v41 = vpop.f32.mrf.mxu0 }
 0x6b2   : > { %v1499_v18 = vmul.f32 %v2237_v41, %v3129_v2  ;;  %v2119_v41 = vld [vmem:[%s3481_s8] ss:$0 sm:$0xff] }
 0x6b3   : > { %v1483_v12 = vpop.f32.mrf.mxu0 }
 0x6b4   : > { %v1497_v63 = vmul.f32 %v3129_v2, %v1483_v12  ;;  %v1502_v34 = vadd.f32 %v3136_v50, %v1499_v18  ;;  %v2120_v18 = vld [vmem:[%s3481_s8 + $0x1] ss:$0 sm:$0xff] }
 0x6b5   : > { %v2238_v3 = vpop.f32.mrf.mxu0 }
 0x6b6   : > { %v1500_v31 = vadd.f32 %v3136_v50, %v1497_v63  ;;  %v1505_v6 = vmax.f32 %v1502_v34, 0.0 }
 0x6b7   : > { %v1486_v32 = vpop.f32.mrf.mxu0 }
 0x6b8   : > { %v1498_v51 = vmul.f32 %v3129_v2, %v1486_v32  ;;  %v1503_v53 = vmax.f32 %v1500_v31, 0.0  ;;  %v1509_v38 = vsel %vm752_vm7, %v1505_v6, 0.0  ;;  %v1112_v2 = vrot.slane %v3209_v44, 4  ;;  %v2121_v31 = vld [vmem:[%s3481_s8 + $0x2] ss:$0 sm:$0xff] }
 0x6ba   : > { %v1501_v54 = vadd.f32 %v3136_v50, %v1498_v51  ;;  %v1506_v15 = vsel %vm752_vm7, %v1503_v53, 0.0  ;;  %v1113_v16 = vadd.f32 %v1112_v2, %v3209_v44 }
 0x6bc   : > { %v1504_v10 = vmax.f32 %v1501_v54, 0.0  ;;  %v1114_v43 = vrot.slane %v1113_v16, 2 }
 0x6be   : > { %v1507_v36 = vsel %vm752_vm7, %v1504_v10, 0.0  ;;  %v1115_v13 = vadd.f32 %v1114_v43, %v1113_v16 }
 0x6bf   : > { %v1508_v37 = vadd.f32 %v1507_v36, %v1506_v15  ;;  %v2491_v15 = vld [vmem:[%s3484_s11] sm:$0xff]  }
 0x6c0   : > { %v1116_v23 = vrot.slane %v1115_v13, 1  ;;  %v2122_v36 = vld [vmem:[%s3483_s10] ss:$0 sm:$0xff] }
 0x6c1   : > { %v1510_v33 = vadd.f32 %v1509_v38, %v1508_v37  ;;  %v2128_v38 = vld [vmem:[%s3483_s10 + $0x1] ss:$0 sm:$0xff] }
 0x6c2   : > { %v1117_v25 = vadd.f32 %v1116_v23, %v1115_v13 }
 0x6c3   : > { %v1511_v35 = vrot.slane %v1510_v33, 4 }
 0x6c4   : > { %v1119_v8 = vmul.f32 0.04347826, %v1117_v25 }
 0x6c5   : > { %v1512_v11 = vadd.f32 %v1511_v35, %v1510_v33 }
 0x6c7   : > { %v1513_v40 = vrot.slane %v1512_v11, 2 }
 0x6c9   : > { %v1514_v42 = vadd.f32 %v1513_v40, %v1512_v11 }
 0x6cb   : > { %v1515_v45 = vrot.slane %v1514_v42, 1 }
 0x6cd   : > { %v1516_v46 = vadd.f32 %v1515_v45, %v1514_v42 }
 0x6cf   : > { %v1517_v50 = vmul.f32 0.041666668, %v1516_v46 }
 0x6d1   : > { %v1518_v59 = vsub.f32 %v1503_v53, %v1517_v50  ;;  %v1519_v4 = vsub.f32 %v1504_v10, %v1517_v50  ;;  %v1520_v5 = vsub.f32 %v1505_v6, %v1517_v50  ;;  %v1537_v7 = vsel %vm1536_vm10, %v3190_v48, %v1517_v50  ;;  %v2490_v10 = vld [vmem:[%s3484_s11 + $0x8] sm:$0xff]   ;;  %v2130_v50 = vld [vmem:[%s3485_s12] ss:$0 sm:$0xff] }
 0x6d2   : > { %v1555_v17 = vpack.c.bf16 %v1537_v7, %v1537_v7 }
 0x6d3   : > { %v1521_v52 = vmul.f32 %v1518_v59, %v1518_v59  ;;  %v1522_v21 = vmul.f32 %v1519_v4, %v1519_v4  ;;  %v1523_v39 = vmul.f32 %v1520_v5, %v1520_v5 }
 0x6d4   : > { %2260 = vmatmul.mubr.msk.bf16.vlgmr.msra.gmra.mxu1 %vm752_vm7, %v1555_v17 }
 0x6d5   : > { %v1524_v55 = vsel %vm752_vm7, %v1521_v52, 0.0  ;;  %v1525_v22 = vsel %vm752_vm7, %v1522_v21, 0.0  ;;  %2279 = vmatprep.mubr.msk.bf16.mxu1 %vm2620_vm9, %v2619_v20  ;;  %v1527_v57 = vsel %vm752_vm7, %v1523_v39, 0.0  ;;  %2276 = vmatpush3.bf16.msra.mxu1 %v2490_v10 }
 0x6d6   : > { %v1526_v56 = vadd.f32 %v1525_v22, %v1524_v55  ;;  %2277 = vmatprep.subr.bf16.mxu1 %v2619_v20 }
 0x6d8   : > { %v1528_v48 = vadd.f32 %v1527_v57, %v1526_v56 }
 0x6d9   : > { %2278 = vmatpush3.bf16.msra.mxu1 %v2491_v15 }
 0x6da   : > { %v1529_v44 = vrot.slane %v1528_v48, 4 }
 0x6dc   : > { %v1530_v58 = vadd.f32 %v1529_v44, %v1528_v48 }
 0x6de   : > { %v1531_v9 = vrot.slane %v1530_v58, 2 }
 0x6e0   : > { %v1532_v24 = vadd.f32 %v1531_v9, %v1530_v58 }
 0x6e2   : > { %v1533_v19 = vrot.slane %v1532_v24, 1 }
 0x6e4   : > { %v1534_v26 = vadd.f32 %v1533_v19, %v1532_v24 }
 0x6e6   : > { %v1535_v27 = vmul.f32 0.04347826, %v1534_v26 }
 0x6e8   : > { %v1538_v28 = vsel %vm1536_vm10, %v1119_v8, %v1535_v27 }
 0x6e9   : > { %v1556_v61 = vpack.c.bf16 %v1538_v28, %v1538_v28 }
 0x6eb   : > { %2248 = vmatmul.mubr.msk.bf16.vlgmr.msra.gmra.mxu0 %vm752_vm7, %v1556_v61 }
 0x6ec   : > { %2271 = vmatprep.mubr.msk.bf16.mxu0 %vm2620_vm9, %v2619_v20  ;;  %2264 = vmatpush3.bf16.msra.mxu0 %v2486_v29 }
 0x6ed   : > { %2265 = vmatprep.subr.bf16.mxu0 %v2619_v20 }
 0x6f0   : > { %2266 = vmatpush3.bf16.msra.mxu0 %v2487_v60 }
 0x6f1   : > { %2267 = vmatprep.subr.bf16.mxu0 %v2619_v20 }
 0x6f4   : > { %2268 = vmatpush3.bf16.msra.mxu0 %v2488_v30 }
 0x6f5   : > { %2269 = vmatprep.subr.bf16.mxu0 %v2619_v20  ;;  %v2129_v20 = vld [vmem:[%s3483_s10 + $0x2] ss:$0 sm:$0xff] }
 0x6f8   : > { %2270 = vmatpush3.bf16.msra.mxu0 %v2489_v0 }
 0x794   : > { %v1685_v14 = vpop.f32.mrf.mxu1 }
 0x796   : > { %v2261_v62 = vpop.f32.mrf.mxu1 }
 0x798   : > { %v1688_v1 = vpop.f32.mrf.mxu1 }
 0x79a   : > { %v2262_v47 = vpop.f32.mrf.mxu1 }
 0x7ab   : > { %v1618_v49 = vpop.f32.mrf.mxu0 }
 0x7ac   : > { %v1686_v12 = vadd.f32 %v1685_v14, %v1618_v49 }
 0x7ad   : > { %v2249_v63 = vpop.f32.mrf.mxu0 }
 0x7ae   : > { %v1696_v3 = vadd.f32 %v2119_v41, %v1686_v12 }
 0x7af   : > { %v1621_v32 = vpop.f32.mrf.mxu0 }
 0x7b0   : > { %v1704_v34 = vmul.f32 %v2120_v18, %v1696_v3  ;;  %1698 = vst.msk [vmem:[%s3498_s30] sm:$0x3] %vm1697_vm11, %v1696_v3  ;;  %s1894_s30 = sand.u32 1, %s2725_s22   ;;  %s2621_s22 = smov [#allocation4]  }
 0x7b1   : > { %v2250_v51 = vpop.f32.mrf.mxu0  ;;  %s3395_s2 = scalar_lea.sflag [#allocation5], %s1894_s30  ;;  %s2500_s4 = sshll.u32 %s2621_s22, 4  ;;  %s2501_s4 = int_to_ptr.vmem [resolvable:$false] %s2500_s4 }
 0x7b2   : > { %v1710_v53 = vadd.f32 %v2121_v31, %v1704_v34  ;;  %s2502_s27 = scalar_lea.vmem %s2501_s4, 64  ;;  %p2503_p0 = scmp.lt.s32.totalorder %s1927_s20, %s2501_s4 }
 0x7b3   : > { %p2504_p1 = scmp.lt.s32.totalorder %s2502_s27, %s2496_s3 }
 0x7b4   : > { %v1711_v54 = vmax.f32 %v1710_v53, 0.0 }
 0x7b5   : > { %p2505_p2 = por %p2504_p1, %p2503_p0 }
 0x7b6   : > { %v1712_v6 = vpack.c.bf16 %v1711_v54, %v1711_v54 }
 0x7b7   : > { %p2506_p3 = pnand %p2505_p2, %p2499_p13 }
 0x7b8   : > { %2272 = vmatmul.mubr.msk.bf16.vlgmr.msra.gmra.mxu0 %vm752_vm7, %v1712_v6 }
 0x878   : > { %v1787_v37 = vpop.f32.mrf.mxu0 }
 0x879   : > { %v1788_v33 = vadd.f32 %v2122_v36, %v1787_v37 }
 0x87a   : > { %v2273_v35 = vpop.f32.mrf.mxu0 }
 0x87b   : > { %v1800_v11 = vmul.f32 %v2128_v38, %v1788_v33  ;;  %1794 = vst.msk [vmem:[%s498_s24] sm:$0x3] %vm1793_vm12, %v1788_v33 }
 0x87c   : > { %v1790_v40 = vpop.f32.mrf.mxu0 }
 0x87d   : > { %v1806_v42 = vadd.f32 %v2129_v20, %v1800_v11 }
 0x87e   : > { %v2274_v45 = vpop.f32.mrf.mxu0 }
 0x87f   : > { %v1807_v46 = vmax.f32 %v1806_v42, 0.0 }
 0x881   : > { %v1808_v2 = vpack.c.bf16 %v1807_v46, %v1807_v46 }
 0x883   : > { %2280 = vmatmul.mubr.msk.bf16.vlgmr.msra.gmra.mxu1 %vm565_vm3, %v1808_v2 }
 0x943   : > { %v1869_v59 = vpop.f32.mrf.mxu1 }
 0x944   : > { %v1870_v4 = vadd.f32 %v2130_v50, %v1869_v59 }
 0x945   : > { %v2281_v5 = vpop.f32.mrf.mxu1 }
 0x946   : > { %v1876_v7 = vsel %vm1875_vm13, %v1870_v4, -inf }
 0x947   : > { %1877 = vmax.xlane.f32.xlu0 %v1876_v7  ;;  %v1872_v16 = vpop.f32.mrf.mxu1 }
 0x949   : > { %v2282_v17 = vpop.f32.mrf.mxu1 }
 0x9d0   : > { %v1878_v52 = vpop.xlane.xlu0 %1877 }
 0x9d1   : > { %v3375_v21 = vsub.f32 %v1870_v4, %v1878_v52 }
 0x9d3   : > { %v1880_v39 = vmul.f32 1.442695, %v3375_v21 }
 0x9d5   : > { %2492 = vpow2.f32 %v1880_v39 }
 0x9e2   : > { %v2493_v55 = vpop.eup %2492 }
 0x9e3   : > { %v1882_v22 = vsel %vm1875_vm13, %v2493_v55, 0.0 }
 0x9e4   : > { %1883 = vadd.xlane.f32.xlu1 %v1882_v22 }
 0x9e5   : > { %2509 = shalt.err (!%p2506_p3)
}
 0x9e6   : > { %s2510_s0 = scalar_lea.hbm %s3387_s23, 32  ;;  %s2514_s26 = scalar_lea.hbm %s3487_s14, 64 }
 0x9e7   : > { %p2511_p4 = scmp.ne.s32.totalorder %s3387_s23, %s2510_s0  ;;  %p2515_p9 = scmp.lt.s32.totalorder %s3387_s23, %s3487_s14 }
 0x9e8   : > { %p2516_p10 = scmp.lt.s32.totalorder %s2514_s26, %s2510_s0 }
 0x9e9   : > { %p2512_p7 = pnand %p2511_p4, %p2744_p5 }
 0x9ea   : > { %p2517_p11 = por %p2516_p10, %p2515_p9 }
 0x9eb   : > { %p2513_p8 = pneg %p2512_p7 }
 0x9ed   : > { %p2518_p12 = pnand %p2517_p11, %p2513_p8 }
 0x9ef   : > { %2521 = shalt.err (!%p2518_p12)
}
 0x9f0   : > { %2284 = dma.vmem_to_hbm [thread:$0]  (%p2744_p5), %s1927_s20, 32, %s3387_s23, %s3395_s2  }
 0x9f1   : > { %s3516_s3 = scalar_lea.vmem [#allocation2], %s3338_s25  ;;  %s3517_s27 = sand.u32 1, %s2604_s19  }
 0x9f2   : > { %s1913_s4 = sshll.u32 %s3516_s3, 4  ;;  %s1890_s24 = scalar_lea.sflag [#allocation3], %s3517_s27  ;;  %s1914_s4 = int_to_ptr.vmem [resolvable:$true] %s1913_s4 }
 0x9f3   : > { %s2522_s30 = scalar_lea.vmem %s1914_s4, 32  ;;  %s2622_s0 = smov [#allocation2]  }
 0x9f4   : > { %p2523_p13 = scmp.ne.s32.totalorder %s1914_s4, %s2522_s30  ;;  %s2526_s26 = sshll.u32 %s2622_s0, 4  ;;  %s2527_s26 = int_to_ptr.vmem [resolvable:$false] %s2526_s26 }
 0x9f5   : > { %s2528_s17 = scalar_lea.vmem %s2527_s26, 64  ;;  %p2529_p2 = scmp.lt.s32.totalorder %s1914_s4, %s2527_s26 }
 0x9f6   : > { %p2524_p0 = pnand %p2523_p13, %p2744_p5  ;;  %p2530_p3 = scmp.lt.s32.totalorder %s2528_s17, %s2522_s30 }
 0x9f8   : > { %p2525_p1 = pneg %p2524_p0  ;;  %p2531_p4 = por %p2530_p3, %p2529_p2 }
 0x9fa   : > { %p2532_p7 = pnand %p2531_p4, %p2525_p1 }
 0x9fc   : > { %2535 = shalt.err (!%p2532_p7)
}
 0x9fd   : > { %s2536_s23 = scalar_lea.hbm %s3393_s1, 32  ;;  %s2540_s3 = scalar_lea.hbm %s3486_s13, 64 }
 0x9fe   : > { %p2537_p8 = scmp.ne.s32.totalorder %s3393_s1, %s2536_s23  ;;  %p2541_p11 = scmp.lt.s32.totalorder %s3393_s1, %s3486_s13 }
 0x9ff   : > { %p2542_p12 = scmp.lt.s32.totalorder %s2540_s3, %s2536_s23 }
 0xa00   : > { %p2538_p9 = pnand %p2537_p8, %p2744_p5 }
 0xa01   : > { %p2543_p13 = por %p2542_p12, %p2541_p11 }
 0xa02   : > { %p2539_p10 = pneg %p2538_p9 }
 0xa04   : > { %p2544_p0 = pnand %p2543_p13, %p2539_p10 }
 0xa06   : > { %2547 = shalt.err (!%p2544_p0)
}
 0xa07   : > { %2283 = dma.vmem_to_hbm [thread:$0]  (%p2744_p5), %s1914_s4, 32, %s3393_s1, %s1890_s24  }
 0xa08   : > { %s505_s30 = scalar_lea.vmem [#allocation6], %s3338_s25  ;;  %s1937_s20 = scalar_lea.hbm %s3488_s15, %s3381_s16 }
 0xa09   : > { %s1939_s26 = sshll.u32 %s505_s30, 4  ;;  %s2623_s1 = smov [#allocation6]   ;;  %s1940_s26 = int_to_ptr.vmem [resolvable:$true] %s1939_s26 }
 0xa0a   : > { %s2548_s22 = scalar_lea.vmem %s1940_s26, 32  ;;  %s2552_s4 = sshll.u32 %s2623_s1, 4  ;;  %s2553_s4 = int_to_ptr.vmem [resolvable:$false] %s2552_s4 }
 0xa0b   : > { %p2549_p1 = scmp.ne.s32.totalorder %s1940_s26, %s2548_s22  ;;  %s2554_s25 = scalar_lea.vmem %s2553_s4, 64 }
 0xa0c   : > { %p2555_p4 = scmp.lt.s32.totalorder %s1940_s26, %s2553_s4  ;;  %p2556_p7 = scmp.lt.s32.totalorder %s2554_s25, %s2548_s22 }
 0xa0d   : > { %p2550_p2 = pnand %p2549_p1, %p2744_p5 }
 0xa0e   : > { %p2557_p8 = por %p2556_p7, %p2555_p4 }
 0xa0f   : > { %p2551_p3 = pneg %p2550_p2 }
 0xa11   : > { %p2558_p9 = pnand %p2557_p8, %p2551_p3 }
 0xa6d   : > { %v1884_v43 = vpop.xlane.xlu1 %1883 }
 0xa6e   : > { %2494 = vlog2.f32 %v1884_v43 }
 0xa7b   : > { %v2495_v56 = vpop.eup %2494 }
 0xa7c   : > { %v1886_v57 = vmul.f32 0.6931472, %v2495_v56 }
 0xa7e   : > { %v1887_v48 = vsub.f32 %v3375_v21, %v1886_v57 }
 0xa80   : > { %1888 = vst.msk [vmem:[%s505_s30] sm:$0x3] %vm1875_vm13, %v1887_v48 }
 0xa81   : > { %2561 = shalt.err (!%p2558_p9)
}
 0xa82   : > { %s2562_s24 = scalar_lea.hbm %s1937_s20, 32  ;;  %s2566_s27 = scalar_lea.hbm %s3488_s15, 64 }
 0xa83   : > { %p2563_p10 = scmp.ne.s32.totalorder %s1937_s20, %s2562_s24  ;;  %p2567_p13 = scmp.lt.s32.totalorder %s1937_s20, %s3488_s15 }
 0xa84   : > { %p2568_p0 = scmp.lt.s32.totalorder %s2566_s27, %s2562_s24 }
 0xa85   : > { %p2564_p11 = pnand %p2563_p10, %p2744_p5 }
 0xa86   : > { %p2569_p1 = por %p2568_p0, %p2567_p13 }
 0xa87   : > { %p2565_p12 = pneg %p2564_p11 }
 0xa89   : > { %p2570_p2 = pnand %p2569_p1, %p2565_p12 }
 0xa8b   : > { %2573 = shalt.err (!%p2570_p2)
}
 0xa8c   : > { %2285 = dma.vmem_to_hbm [thread:$0]  (%p2744_p5), %s1940_s26, 32, %s1937_s20, %s3395_s2  }
 0xa8d PF: > { %p2299_p3 = scmp.ge.s32.totalorder %s2612_s21, 2  ;;  %s1951_s17 = sand.u32 1, %s2600_s18  }
 0xa8e   : > { %s1952_s23 = scalar_lea.sflag [#allocation3], %s1951_s17 }
 0xa8f   : > { %p2290_p4 = pnand %p2299_p3, %p2748_p6 }
 0xa91   : > { %p2291_p7 = pneg %p2290_p4 }
 0xa93   : > { %2591 = dma.done.wait (%p2291_p7), %s1952_s23, 32  }
 0xa94   : > { %2593 = vsyncadd (%p2291_p7), %s1952_s23, 4294967264  ;;  %s3518_s22 = sadd.s32 4294967294, %s2612_s21  }
 0xa95   : > { %s1960_s1 = sand.u32 1, %s3518_s22  }
 0xa96   : > { %s1961_s4 = scalar_lea.sflag [#allocation5], %s1960_s1 }
 0xa97   : > { %2595 = dma.done.wait (%p2291_p7), %s1961_s4, 64  }
 0xa98   : > { %2597 = vsyncadd (%p2291_p7), %s1961_s4, 4294967232  ;;  %s3519_s21 = sld [smem:[#allocation10_spill]]  ;;  %s3522_s18 = smov %s2604_s19 }
 0xa99   : > { %s3520_s2 = sld [smem:[#allocation9_spill]] }
 0xa9a   : > { %s3521_s20 = sld [smem:[#allocation11_spill]] }
 0xa9e   : > { %p29_p5 = scmp.ge.s32.totalorder %s3519_s21, 4  }
 0xa9f   : > { %s3523_s19 = smov %s3520_s2 }
 0xaa0   :  { %31 = sbr.rel (!%p29_p5) target bundleno = 11 (0xb), region = 140 }
 0xaa5   :  { %1975 = vsyncpa [#allocation3], 1 }
 0xaa6   :  { %1977 = vsyncpa [#allocation3 + $0x1], 1 }
 0xaa7   :  { %1978 = vsyncpa [#allocation5], 1 }
 0xaa8   :  { %1980 = vsyncpa [#allocation5 + $0x1], 1 }

</bundles_post_ra>
